<compile_context>
chip_gen: v6e
topology: v6e:2x2x1
jax: 0.10.0
libtpu: 0.0.40
codegen_flags: <defaults>
</compile_context>

<pallas_src>
import jax
import jax.numpy as jnp
from jax.experimental import pallas as pl
from jax.experimental.pallas import tpu as pltpu


def _round_up(v, m):
    return ((v + m - 1) // m) * m


def _pick_tile_h(H, W, target_rows=1024):
    """Largest divisor of H such that TH*W <= target_rows (never a full-M fallback)."""
    th = max(1, min(H, max(1, target_rows // max(W, 1))))
    while H % th:
        th -= 1
    return th


def _make_conv_kernel(K, TH, W, Cin_p):
    def kernel(x_ref, w_ref, b_ref, o_ref):
        # x_ref: [1, H+2p, W+2p, Cin_p] full padded image (resident across h tiles)
        # w_ref: [K*K, Cin_p, Cout_p]   b_ref: [1, Cout_p] (f32)
        # o_ref: [1, TH*W, Cout_p]
        h0 = pl.program_id(1) * TH
        acc = None
        for ky in range(K):          # static unrolled tap loop -> fused im2col
            for kx in range(K):
                patch = x_ref[0, pl.ds(h0 + ky, TH), pl.ds(kx, W), :]
                contrib = jnp.dot(patch.reshape(TH * W, Cin_p),
                                  w_ref[ky * K + kx],
                                  preferred_element_type=jnp.float32)
                acc = contrib if acc is None else acc + contrib
        o_ref[0] = (acc + b_ref[...]).astype(o_ref.dtype)
    return kernel


def conv2d_pallas(x_nchw, weight, bias, *, lane=128, target_rows=1024):
    """Equivalent of Conv2d.forward for the non-resampling path.

    x_nchw: [N, Cin, H, W]   weight: [Cout, Cin, K, K]   bias: [Cout] or None
    returns [N, Cout, H, W]
    """
    N, Cin, H, W = x_nchw.shape
    Cout, _, K, _ = weight.shape
    p = K // 2  # w_pad in the PyTorch module
    dt = x_nchw.dtype

    Cin_p = _round_up(Cin, lane)
    Cout_p = _round_up(Cout, lane)
    TH = _pick_tile_h(H, W, target_rows)
    n_h = H // TH
    Hp, Wp = H + 2 * p, W + 2 * p

    # --- glue: NCHW -> NHWC, spatial halo + channel zero-pad (lane-dense) ---
    x = jnp.transpose(x_nchw, (0, 2, 3, 1))                       # [N, H, W, Cin]
    xp = jnp.pad(x, ((0, 0), (p, p), (p, p), (0, Cin_p - Cin)))   # [N, Hp, Wp, Cin_p]

    # weight [Cout, Cin, K, K] -> tap-major [K*K, Cin_p, Cout_p] (matches kernel loop)
    w4 = jnp.transpose(weight.astype(dt), (2, 3, 1, 0)).reshape(K * K, Cin, Cout)
    w4 = jnp.pad(w4, ((0, 0), (0, Cin_p - Cin), (0, Cout_p - Cout)))

    b = bias if bias is not None else jnp.zeros((Cout,), jnp.float32)
    b2 = jnp.pad(b.astype(jnp.float32), (0, Cout_p - Cout)).reshape(1, Cout_p)

    kernel = _make_conv_kernel(K, TH, W, Cin_p)

    # VMEM budget estimate (double-buffered blocks + f32 accumulator temporaries).
    bytes_in = jnp.dtype(dt).itemsize
    vmem_est = (2 * Hp * Wp * Cin_p * bytes_in
                + 2 * K * K * Cin_p * Cout_p * bytes_in
                + 2 * Cout_p * 4
                + 2 * TH * W * Cout_p * bytes_in
                + 3 * TH * W * Cout_p * 4)
    cp_kwargs = dict(dimension_semantics=("parallel", "parallel"))
    if vmem_est > 12 * 1024 * 1024:
        # raise above the default scoped limit, with headroom but under physical VMEM
        cp_kwargs["vmem_limit_bytes"] = min(int(vmem_est * 1.5), 48 * 1024 * 1024)

    out_flat = pl.pallas_call(
        kernel,
        out_shape=jax.ShapeDtypeStruct((N, H * W, Cout_p), dt),
        grid_spec=pltpu.PrefetchScalarGridSpec(
            num_scalar_prefetch=0,
            grid=(N, n_h),
            in_specs=[
                # full padded image per batch element; constant along h -> DMA'd once
                pl.BlockSpec((1, Hp, Wp, Cin_p), lambda n, h: (n, 0, 0, 0)),
                # full weight stack (constant index map)
                pl.BlockSpec((K * K, Cin_p, Cout_p), lambda n, h: (0, 0, 0)),
                # bias row (f32)
                pl.BlockSpec((1, Cout_p), lambda n, h: (0, 0)),
            ],
            out_specs=pl.BlockSpec((1, TH * W, Cout_p), lambda n, h: (n, h, 0)),
        ),
        compiler_params=pltpu.CompilerParams(**cp_kwargs),
    )(xp, w4, b2)

    # --- glue: drop channel padding, back to NCHW ---
    out = out_flat.reshape(N, H, W, Cout_p)[..., :Cout]
    return jnp.transpose(out, (0, 3, 1, 2))


if __name__ == "__main__":
    # Small shapes consistent with the module: N=2, Cin=4, H=W=16, Cout=8, kernel=3.
    N, Cin, H, W = 2, 4, 16, 16
    Cout, K = 8, 3

    key = jax.random.PRNGKey(0)
    kx_, kw_, kb_ = jax.random.split(key, 3)

    x = jax.random.normal(kx_, (N, Cin, H, W), jnp.float32)

    # Deterministic param init mirroring weight_init('kaiming_normal', ...):
    #   weight = sqrt(1/fan_in) * randn([Cout, Cin, K, K]) * init_weight (=1)
    #   bias   = sqrt(1/fan_in) * randn([Cout])            * init_bias  (=0)
    fan_in = Cin * K * K
    init_weight, init_bias = 1.0, 0.0
    weight = jnp.sqrt(1.0 / fan_in) * jax.random.normal(
        kw_, (Cout, Cin, K, K), jnp.float32) * init_weight
    bias = jnp.sqrt(1.0 / fan_in) * jax.random.normal(
        kb_, (Cout,), jnp.float32) * init_bias

    out = jax.block_until_ready(conv2d_pallas(x, weight, bias))

    # Reference check against XLA conv (same semantics as F.conv2d, padding=k//2).
    ref = jax.lax.conv_general_dilated(
        x, weight, window_strides=(1, 1),
        padding=((K // 2, K // 2), (K // 2, K // 2)),
        dimension_numbers=("NCHW", "OIHW", "NCHW"))
    ref = ref + bias.reshape(1, -1, 1, 1)

    assert out.shape == (N, Cout, H, W)
    assert jnp.allclose(out, ref, atol=1e-4, rtol=1e-4), "mismatch vs reference conv"

    print("KERNEL_OK")
</pallas_src>

<mosaic_0001>
module attributes {stable_mosaic.version = 11 : i64} {
  func.func @kernel(%arg0: i32, %arg1: i32, %arg2: memref<1x18x18x128xf32, #tpu.memory_space<vmem>>, %arg3: memref<9x128x128xf32, #tpu.memory_space<vmem>>, %arg4: memref<1x128xf32, #tpu.memory_space<vmem>>, %arg5: memref<1x256x128xf32, #tpu.memory_space<vmem>>) attributes {dimension_semantics = [#tpu.dimension_semantics<parallel>, #tpu.dimension_semantics<parallel>], iteration_bounds = array<i64: 2, 1>, scalar_prefetch = 0 : i64, scratch_operands = 0 : i64, tpu.core_type = #tpu.core_type<tc>, window_params = [{transform_indices = @transform_0, window_bounds = array<i64: 1, 18, 18, 128>}, {pipeline_mode = #tpu.pipeline_mode<synchronous>, transform_indices = @transform_1, window_bounds = array<i64: 9, 128, 128>}, {pipeline_mode = #tpu.pipeline_mode<synchronous>, transform_indices = @transform_2, window_bounds = array<i64: 1, 128>}, {transform_indices = @transform_3, window_bounds = array<i64: 1, 256, 128>}]} {
    %c16_i32 = arith.constant 16 : i32
    %0 = arith.muli %arg1, %c16_i32 : i32
    %c0_i32 = arith.constant 0 : i32
    %1 = arith.addi %0, %c0_i32 : i32
    %c0 = arith.constant 0 : index
    %2 = arith.index_cast %1 : i32 to index
    %c0_0 = arith.constant 0 : index
    %c0_1 = arith.constant 0 : index
    %3 = vector.load %arg2[%c0, %2, %c0_0, %c0_1] : memref<1x18x18x128xf32, #tpu.memory_space<vmem>>, vector<1x16x16x128xf32>
    %4 = vector.shape_cast %3 : vector<1x16x16x128xf32> to vector<16x16x128xf32>
    %5 = vector.shape_cast %4 : vector<16x16x128xf32> to vector<256x128xf32>
    %c0_2 = arith.constant 0 : index
    %c0_3 = arith.constant 0 : index
    %c0_4 = arith.constant 0 : index
    %6 = vector.load %arg3[%c0_2, %c0_3, %c0_4] : memref<9x128x128xf32, #tpu.memory_space<vmem>>, vector<1x128x128xf32>
    %7 = vector.shape_cast %6 : vector<1x128x128xf32> to vector<128x128xf32>
    %cst = arith.constant dense<0.000000e+00> : vector<256x128xf32>
    %8 = tpu.matmul %5, %7, %cst {dimension_numbers = #tpu.dot_dimension_numbers<[1], [0], [0], [1], [0, 0, 1, 1], [], []>} : vector<256x128xf32>, vector<128x128xf32>, vector<256x128xf32> -> vector<256x128xf32>
    %c0_i32_5 = arith.constant 0 : i32
    %9 = arith.addi %0, %c0_i32_5 : i32
    %c0_6 = arith.constant 0 : index
    %10 = arith.index_cast %9 : i32 to index
    %c1 = arith.constant 1 : index
    %c0_7 = arith.constant 0 : index
    %11 = vector.load %arg2[%c0_6, %10, %c1, %c0_7] : memref<1x18x18x128xf32, #tpu.memory_space<vmem>>, vector<1x16x16x128xf32>
    %12 = vector.shape_cast %11 : vector<1x16x16x128xf32> to vector<16x16x128xf32>
    %13 = vector.shape_cast %12 : vector<16x16x128xf32> to vector<256x128xf32>
    %c1_8 = arith.constant 1 : index
    %c0_9 = arith.constant 0 : index
    %c0_10 = arith.constant 0 : index
    %14 = vector.load %arg3[%c1_8, %c0_9, %c0_10] : memref<9x128x128xf32, #tpu.memory_space<vmem>>, vector<1x128x128xf32>
    %15 = vector.shape_cast %14 : vector<1x128x128xf32> to vector<128x128xf32>
    %cst_11 = arith.constant dense<0.000000e+00> : vector<256x128xf32>
    %16 = tpu.matmul %13, %15, %cst_11 {dimension_numbers = #tpu.dot_dimension_numbers<[1], [0], [0], [1], [0, 0, 1, 1], [], []>} : vector<256x128xf32>, vector<128x128xf32>, vector<256x128xf32> -> vector<256x128xf32>
    %17 = arith.addf %8, %16 : vector<256x128xf32>
    %c0_i32_12 = arith.constant 0 : i32
    %18 = arith.addi %0, %c0_i32_12 : i32
    %c0_13 = arith.constant 0 : index
    %19 = arith.index_cast %18 : i32 to index
    %c2 = arith.constant 2 : index
    %c0_14 = arith.constant 0 : index
    %20 = vector.load %arg2[%c0_13, %19, %c2, %c0_14] : memref<1x18x18x128xf32, #tpu.memory_space<vmem>>, vector<1x16x16x128xf32>
    %21 = vector.shape_cast %20 : vector<1x16x16x128xf32> to vector<16x16x128xf32>
    %22 = vector.shape_cast %21 : vector<16x16x128xf32> to vector<256x128xf32>
    %c2_15 = arith.constant 2 : index
    %c0_16 = arith.constant 0 : index
    %c0_17 = arith.constant 0 : index
    %23 = vector.load %arg3[%c2_15, %c0_16, %c0_17] : memref<9x128x128xf32, #tpu.memory_space<vmem>>, vector<1x128x128xf32>
    %24 = vector.shape_cast %23 : vector<1x128x128xf32> to vector<128x128xf32>
    %cst_18 = arith.constant dense<0.000000e+00> : vector<256x128xf32>
    %25 = tpu.matmul %22, %24, %cst_18 {dimension_numbers = #tpu.dot_dimension_numbers<[1], [0], [0], [1], [0, 0, 1, 1], [], []>} : vector<256x128xf32>, vector<128x128xf32>, vector<256x128xf32> -> vector<256x128xf32>
    %26 = arith.addf %17, %25 : vector<256x128xf32>
    %c1_i32 = arith.constant 1 : i32
    %27 = arith.addi %0, %c1_i32 : i32
    %c0_19 = arith.constant 0 : index
    %28 = arith.index_cast %27 : i32 to index
    %c0_20 = arith.constant 0 : index
    %c0_21 = arith.constant 0 : index
    %29 = vector.load %arg2[%c0_19, %28, %c0_20, %c0_21] : memref<1x18x18x128xf32, #tpu.memory_space<vmem>>, vector<1x16x16x128xf32>
    %30 = vector.shape_cast %29 : vector<1x16x16x128xf32> to vector<16x16x128xf32>
    %31 = vector.shape_cast %30 : vector<16x16x128xf32> to vector<256x128xf32>
    %c3 = arith.constant 3 : index
    %c0_22 = arith.constant 0 : index
    %c0_23 = arith.constant 0 : index
    %32 = vector.load %arg3[%c3, %c0_22, %c0_23] : memref<9x128x128xf32, #tpu.memory_space<vmem>>, vector<1x128x128xf32>
    %33 = vector.shape_cast %32 : vector<1x128x128xf32> to vector<128x128xf32>
    %cst_24 = arith.constant dense<0.000000e+00> : vector<256x128xf32>
    %34 = tpu.matmul %31, %33, %cst_24 {dimension_numbers = #tpu.dot_dimension_numbers<[1], [0], [0], [1], [0, 0, 1, 1], [], []>} : vector<256x128xf32>, vector<128x128xf32>, vector<256x128xf32> -> vector<256x128xf32>
    %35 = arith.addf %26, %34 : vector<256x128xf32>
    %c1_i32_25 = arith.constant 1 : i32
    %36 = arith.addi %0, %c1_i32_25 : i32
    %c0_26 = arith.constant 0 : index
    %37 = arith.index_cast %36 : i32 to index
    %c1_27 = arith.constant 1 : index
    %c0_28 = arith.constant 0 : index
    %38 = vector.load %arg2[%c0_26, %37, %c1_27, %c0_28] : memref<1x18x18x128xf32, #tpu.memory_space<vmem>>, vector<1x16x16x128xf32>
    %39 = vector.shape_cast %38 : vector<1x16x16x128xf32> to vector<16x16x128xf32>
    %40 = vector.shape_cast %39 : vector<16x16x128xf32> to vector<256x128xf32>
    %c4 = arith.constant 4 : index
    %c0_29 = arith.constant 0 : index
    %c0_30 = arith.constant 0 : index
    %41 = vector.load %arg3[%c4, %c0_29, %c0_30] : memref<9x128x128xf32, #tpu.memory_space<vmem>>, vector<1x128x128xf32>
    %42 = vector.shape_cast %41 : vector<1x128x128xf32> to vector<128x128xf32>
    %cst_31 = arith.constant dense<0.000000e+00> : vector<256x128xf32>
    %43 = tpu.matmul %40, %42, %cst_31 {dimension_numbers = #tpu.dot_dimension_numbers<[1], [0], [0], [1], [0, 0, 1, 1], [], []>} : vector<256x128xf32>, vector<128x128xf32>, vector<256x128xf32> -> vector<256x128xf32>
    %44 = arith.addf %35, %43 : vector<256x128xf32>
    %c1_i32_32 = arith.constant 1 : i32
    %45 = arith.addi %0, %c1_i32_32 : i32
    %c0_33 = arith.constant 0 : index
    %46 = arith.index_cast %45 : i32 to index
    %c2_34 = arith.constant 2 : index
    %c0_35 = arith.constant 0 : index
    %47 = vector.load %arg2[%c0_33, %46, %c2_34, %c0_35] : memref<1x18x18x128xf32, #tpu.memory_space<vmem>>, vector<1x16x16x128xf32>
    %48 = vector.shape_cast %47 : vector<1x16x16x128xf32> to vector<16x16x128xf32>
    %49 = vector.shape_cast %48 : vector<16x16x128xf32> to vector<256x128xf32>
    %c5 = arith.constant 5 : index
    %c0_36 = arith.constant 0 : index
    %c0_37 = arith.constant 0 : index
    %50 = vector.load %arg3[%c5, %c0_36, %c0_37] : memref<9x128x128xf32, #tpu.memory_space<vmem>>, vector<1x128x128xf32>
    %51 = vector.shape_cast %50 : vector<1x128x128xf32> to vector<128x128xf32>
    %cst_38 = arith.constant dense<0.000000e+00> : vector<256x128xf32>
    %52 = tpu.matmul %49, %51, %cst_38 {dimension_numbers = #tpu.dot_dimension_numbers<[1], [0], [0], [1], [0, 0, 1, 1], [], []>} : vector<256x128xf32>, vector<128x128xf32>, vector<256x128xf32> -> vector<256x128xf32>
    %53 = arith.addf %44, %52 : vector<256x128xf32>
    %c2_i32 = arith.constant 2 : i32
    %54 = arith.addi %0, %c2_i32 : i32
    %c0_39 = arith.constant 0 : index
    %55 = arith.index_cast %54 : i32 to index
    %c0_40 = arith.constant 0 : index
    %c0_41 = arith.constant 0 : index
    %56 = vector.load %arg2[%c0_39, %55, %c0_40, %c0_41] : memref<1x18x18x128xf32, #tpu.memory_space<vmem>>, vector<1x16x16x128xf32>
    %57 = vector.shape_cast %56 : vector<1x16x16x128xf32> to vector<16x16x128xf32>
    %58 = vector.shape_cast %57 : vector<16x16x128xf32> to vector<256x128xf32>
    %c6 = arith.constant 6 : index
    %c0_42 = arith.constant 0 : index
    %c0_43 = arith.constant 0 : index
    %59 = vector.load %arg3[%c6, %c0_42, %c0_43] : memref<9x128x128xf32, #tpu.memory_space<vmem>>, vector<1x128x128xf32>
    %60 = vector.shape_cast %59 : vector<1x128x128xf32> to vector<128x128xf32>
    %cst_44 = arith.constant dense<0.000000e+00> : vector<256x128xf32>
    %61 = tpu.matmul %58, %60, %cst_44 {dimension_numbers = #tpu.dot_dimension_numbers<[1], [0], [0], [1], [0, 0, 1, 1], [], []>} : vector<256x128xf32>, vector<128x128xf32>, vector<256x128xf32> -> vector<256x128xf32>
    %62 = arith.addf %53, %61 : vector<256x128xf32>
    %c2_i32_45 = arith.constant 2 : i32
    %63 = arith.addi %0, %c2_i32_45 : i32
    %c0_46 = arith.constant 0 : index
    %64 = arith.index_cast %63 : i32 to index
    %c1_47 = arith.constant 1 : index
    %c0_48 = arith.constant 0 : index
    %65 = vector.load %arg2[%c0_46, %64, %c1_47, %c0_48] : memref<1x18x18x128xf32, #tpu.memory_space<vmem>>, vector<1x16x16x128xf32>
    %66 = vector.shape_cast %65 : vector<1x16x16x128xf32> to vector<16x16x128xf32>
    %67 = vector.shape_cast %66 : vector<16x16x128xf32> to vector<256x128xf32>
    %c7 = arith.constant 7 : index
    %c0_49 = arith.constant 0 : index
    %c0_50 = arith.constant 0 : index
    %68 = vector.load %arg3[%c7, %c0_49, %c0_50] : memref<9x128x128xf32, #tpu.memory_space<vmem>>, vector<1x128x128xf32>
    %69 = vector.shape_cast %68 : vector<1x128x128xf32> to vector<128x128xf32>
    %cst_51 = arith.constant dense<0.000000e+00> : vector<256x128xf32>
    %70 = tpu.matmul %67, %69, %cst_51 {dimension_numbers = #tpu.dot_dimension_numbers<[1], [0], [0], [1], [0, 0, 1, 1], [], []>} : vector<256x128xf32>, vector<128x128xf32>, vector<256x128xf32> -> vector<256x128xf32>
    %71 = arith.addf %62, %70 : vector<256x128xf32>
    %c2_i32_52 = arith.constant 2 : i32
    %72 = arith.addi %0, %c2_i32_52 : i32
    %c0_53 = arith.constant 0 : index
    %73 = arith.index_cast %72 : i32 to index
    %c2_54 = arith.constant 2 : index
    %c0_55 = arith.constant 0 : index
    %74 = vector.load %arg2[%c0_53, %73, %c2_54, %c0_55] : memref<1x18x18x128xf32, #tpu.memory_space<vmem>>, vector<1x16x16x128xf32>
    %75 = vector.shape_cast %74 : vector<1x16x16x128xf32> to vector<16x16x128xf32>
    %76 = vector.shape_cast %75 : vector<16x16x128xf32> to vector<256x128xf32>
    %c8 = arith.constant 8 : index
    %c0_56 = arith.constant 0 : index
    %c0_57 = arith.constant 0 : index
    %77 = vector.load %arg3[%c8, %c0_56, %c0_57] : memref<9x128x128xf32, #tpu.memory_space<vmem>>, vector<1x128x128xf32>
    %78 = vector.shape_cast %77 : vector<1x128x128xf32> to vector<128x128xf32>
    %cst_58 = arith.constant dense<0.000000e+00> : vector<256x128xf32>
    %79 = tpu.matmul %76, %78, %cst_58 {dimension_numbers = #tpu.dot_dimension_numbers<[1], [0], [0], [1], [0, 0, 1, 1], [], []>} : vector<256x128xf32>, vector<128x128xf32>, vector<256x128xf32> -> vector<256x128xf32>
    %80 = arith.addf %71, %79 : vector<256x128xf32>
    %c0_59 = arith.constant 0 : index
    %c0_60 = arith.constant 0 : index
    %81 = vector.load %arg4[%c0_59, %c0_60] : memref<1x128xf32, #tpu.memory_space<vmem>>, vector<1x128xf32>
    %82 = vector.broadcast %81 : vector<1x128xf32> to vector<256x128xf32>
    %83 = arith.addf %80, %82 : vector<256x128xf32>
    %c0_61 = arith.constant 0 : index
    %c0_62 = arith.constant 0 : index
    %c0_63 = arith.constant 0 : index
    %84 = vector.load %arg5[%c0_61, %c0_62, %c0_63] : memref<1x256x128xf32, #tpu.memory_space<vmem>>, vector<1x256x128xf32>
    %85 = vector.shape_cast %84 : vector<1x256x128xf32> to vector<256x128xf32>
    %86 = vector.shape_cast %83 : vector<256x128xf32> to vector<1x256x128xf32>
    tpu.vector_store %arg5[%c0_61, %c0_62, %c0_63], %86 {strides = array<i32>} : memref<1x256x128xf32, #tpu.memory_space<vmem>>, vector<1x256x128xf32>,
    return
  }
  func.func @transform_0(%arg0: i32, %arg1: i32) -> (i32, i32, i32, i32) {
    %c0_i32 = arith.constant 0 : i32
    %c0_i32_0 = arith.constant 0 : i32
    %c0_i32_1 = arith.constant 0 : i32
    %c0_i32_2 = arith.constant 0 : i32
    return %arg0, %c0_i32, %c0_i32_0, %c0_i32_1 : i32, i32, i32, i32
  }
  func.func @transform_1(%arg0: i32, %arg1: i32) -> (i32, i32, i32) {
    %c0_i32 = arith.constant 0 : i32
    %c0_i32_0 = arith.constant 0 : i32
    %c0_i32_1 = arith.constant 0 : i32
    %c0_i32_2 = arith.constant 0 : i32
    return %c0_i32, %c0_i32_0, %c0_i32_1 : i32, i32, i32
  }
  func.func @transform_2(%arg0: i32, %arg1: i32) -> (i32, i32) {
    %c0_i32 = arith.constant 0 : i32
    %c0_i32_0 = arith.constant 0 : i32
    %c0_i32_1 = arith.constant 0 : i32
    return %c0_i32, %c0_i32_0 : i32, i32
  }
  func.func @transform_3(%arg0: i32, %arg1: i32) -> (i32, i32, i32) {
    %c0_i32 = arith.constant 0 : i32
    %c0_i32_0 = arith.constant 0 : i32
    return %arg0, %arg1, %c0_i32 : i32, i32, i32
  }
}

</mosaic_0001>

<bundles_post_ra>
// kernel: tpu_custom_call.1
= control target key start
LH: loop header
LB: loop body
LE: loop exit
PB: predicated region body
PF: predicated region fallthrough
CT: control target
= control target key end

     0   :  { %8 = vsyncpa [#allocation3], 0  ;;  %s6403_s0 = inlined_call_operand.vmem [shape: f32[2,18,18,128], index: 0, kind: input, shape index: {}]   ;;  %s6404_s1 = inlined_call_operand.vmem [shape: f32[9,128,128], index: 1, kind: input, shape index: {}]   ;;  %s6405_s2 = inlined_call_operand.vmem [shape: f32[1,128], index: 2, kind: input, shape index: {}]   ;;  %s6406_s3 = inlined_call_operand.hbm [shape: f32[2,256,128], index: 3, kind: output, shape index: {}]  }
   0x1   :  { %10 = vsyncpa [#allocation3 + $0x1], 0  ;;  %s4729_s12 = smov 0   ;;  %s4731_s13 = smov 0  }
   0x2   :  { %s4733_s14 = smov 0   ;;  %s4735_s15 = smov 0  }
   0x3   :  { %s4737_s16 = smov 0   ;;  %s4739_s17 = smov 0  }
   0x4 LB: > { %s3052_s18 = sadd.s32 4294967295, %s4704_s17   ;;  %s3053_s19 = sadd.s32 4294967294, %s4704_s17   ;;  %s4704_s17 = sphi %s4739_s17, %s16_s17   ;;  %s4700_s16 = sphi %s4737_s16, %s6585_s16   ;;  %s4696_s15 = sphi %s4735_s15, %s6584_s15   ;;  %s4692_s14 = sphi %s4733_s14, %s6583_s14   ;;  %s4688_s13 = sphi %s4731_s13, %s6582_s13   ;;  %s4684_s12 = sphi %s4729_s12, %s6581_s12  }
   0x5   : > { %s28_s20 = sadd.s32 1, %s4700_s16  ;;  %s105_s21 = sadd.s32 1, %s4692_s14 }
   0x6   : > { %p30_p0 = scmp.ge.s32.totalorder %s28_s20, 2  ;;  %p115_p1 = scmp.ne.s32.totalorder %s4692_s14, %s4688_s13 }
   0x7   : > { %p116_p2 = scmp.eq.s32.totalorder %s3052_s18, 1  ;;  %p121_p3 = scmp.ne.s32.totalorder %s4688_s13, %s4684_s12 }
   0x8   : > { %s6587_s20 = smov (%p30_p0, %s28_s20), 0  ;;  %p122_p5 = scmp.eq.s32.totalorder %s3053_s19, 1 }
   0x9   : > { %p4769_p4 = por %p116_p2, %p115_p1  ;;  %s100_s23 = ssub.s32 %s4700_s16, %s6587_s20 }
   0xa   : > { %p3056_p6 = scmp.ge.s32.totalorder %s4704_s17, 1  ;;  %p103_p7 = scmp.eq.s32.totalorder %s100_s23, 0 }
   0xb   : > { %p4776_p8 = por %p122_p5, %p121_p3  ;;  %p154_p9 = scmp.lt.s32.totalorder %s4704_s17, 3 }
   0xc   : > { %s4782_s25 = scalar_select %p103_p7, %s4692_s14, %s105_s21  }
   0xd   : > { %p155_p10 = pnand %p3056_p6, %p154_p9 }
   0xf   : > { %158 = sbr.rel (%p155_p10) target bundleno = 568 (0x238), region = 32 }
  0x14   : > { %v3074_v0 = vld [vmem:[%s6404_s1 + $0xf8] sm:$0xff]  ;;  %v3073_v1 = vld [vmem:[%s6404_s1 + $0xf0] sm:$0xff]  ;;  %v3072_v2 = vld [vmem:[%s6404_s1 + $0xe8] sm:$0xff]  ;;  %p178_p11 = scmp.lt.s32.totalorder %s4696_s15, 1  ;;  %s3385_s6 = sshll.u32 %s4696_s15, 12 }
  0x15   : > { %4538 = vmatprep.subr.mxu1 %v3074_v0  ;;  %3818 = vmatprep.subr.mxu0 %v3074_v0  ;;  %v3071_v3 = vld [vmem:[%s6404_s1 + $0xe0] sm:$0xff]  ;;  %v3070_v4 = vld [vmem:[%s6404_s1 + $0xd8] sm:$0xff]  ;;  %v3069_v5 = vld [vmem:[%s6404_s1 + $0xd0] sm:$0xff]  ;;  %s6349_s10 = scalar_lea.hbm %s6406_s3, %s3385_s6  ;;  %s4706_s18 = smov [#allocation2]  }
  0x16   : > { %4554 = vmatpush3.msra.mxu1 %v3074_v0  ;;  %3819 = vmatpush3.msra.mxu0 %v3074_v0  ;;  %v3068_v6 = vld [vmem:[%s6404_s1 + $0xc8] sm:$0xff]  ;;  %v3067_v7 = vld [vmem:[%s6404_s1 + $0xc0] sm:$0xff]  ;;  %v3066_v8 = vld [vmem:[%s6404_s1 + $0xb8] sm:$0xff]  ;;  %s179_s4 = scalar_select %p178_p11, %s4696_s15, 1 }
  0x17   : > { %4539 = vmatprep.subr.mxu1 %v3073_v1  ;;  %3820 = vmatprep.subr.mxu0 %v3073_v1  ;;  %v3065_v9 = vld [vmem:[%s6404_s1 + $0xb0] sm:$0xff]  ;;  %v3064_v10 = vld [vmem:[%s6404_s1 + $0xa8] sm:$0xff]  ;;  %v3063_v11 = vld [vmem:[%s6404_s1 + $0xa0] sm:$0xff]  ;;  %s4632_s19 = sshll.u32 %s4706_s18, 4  ;;  %s4633_s19 = int_to_ptr.vmem [resolvable:$false] %s4632_s19 }
  0x18   : > { %4555 = vmatpush3.msra.mxu1 %v3073_v1  ;;  %3821 = vmatpush3.msra.mxu0 %v3073_v1  ;;  %v3062_v12 = vld [vmem:[%s6404_s1 + $0x98] sm:$0xff]  ;;  %s4570_s9 = smul.u32 432, %s179_s4  ;;  %v3061_v13 = vld [vmem:[%s6404_s1 + $0x90] sm:$0xff]  ;;  %v3060_v14 = vld [vmem:[%s6404_s1 + $0x88] sm:$0xff]  ;;  %s4634_s21 = scalar_lea.vmem %s4633_s19, 8192 }
  0x19   : > { %4540 = vmatprep.subr.mxu1 %v3072_v2  ;;  %3822 = vmatprep.subr.mxu0 %v3072_v2  ;;  %v3059_v15 = vld [vmem:[%s6404_s1 + $0x80] sm:$0xff]  ;;  %v234_v19 = vld [vmem:[%s6404_s1 + $0x78] sm:$0xff]  ;;  %v233_v22 = vld [vmem:[%s6404_s1 + $0x70] sm:$0xff] }
  0x1a   : > { %4556 = vmatpush3.msra.mxu1 %v3072_v2  ;;  %3823 = vmatpush3.msra.mxu0 %v3072_v2  ;;  %s4834_s26 = scalar_lea.vmem %s6403_s0, %s4570_s9  ;;  %v3090_v21 = vld [vmem:[%s6404_s1 + $0x178] sm:$0xff]  ;;  %v3089_v24 = vld [vmem:[%s6404_s1 + $0x170] sm:$0xff]  ;;  %v232_v27 = vld [vmem:[%s6404_s1 + $0x68] sm:$0xff] }
  0x1b   : > { %4541 = vmatprep.subr.mxu1 %v3071_v3  ;;  %3824 = vmatprep.subr.mxu0 %v3071_v3  ;;  %v4840_v16 = vld [vmem:[%s4834_s26 + $0xc1] sm:$0xff]  ;;  %v4844_v18 = vld [vmem:[%s4834_s26 + $0xc9] sm:$0xff]  ;;  %v4859_v23 = vld [vmem:[%s4834_s26 + $0xd9] sm:$0xff] }
  0x1c   : > { %4557 = vmatpush3.msra.mxu1 %v3071_v3  ;;  %3825 = vmatpush3.msra.mxu0 %v3071_v3  ;;  %v235_v17 = vld [vmem:[%s4834_s26 + $0x1] sm:$0xff]  ;;  %v236_v20 = vld [vmem:[%s4834_s26 + $0x9] sm:$0xff]  ;;  %v4865_v25 = vld [vmem:[%s4834_s26 + $0x19] sm:$0xff] }
  0x1d   : > { %4542 = vmatprep.subr.mxu1 %v3070_v4  ;;  %3826 = vmatprep.subr.mxu0 %v3070_v4  ;;  %v4868_v26 = vld [vmem:[%s4834_s26 + $0xe1] sm:$0xff]  ;;  %v4886_v31 = vld [vmem:[%s4834_s26 + $0xf1] sm:$0xff]  ;;  %v4896_v34 = vld [vmem:[%s4834_s26 + $0xf9] sm:$0xff] }
  0x1e   : > { %4558 = vmatpush3.msra.mxu1 %v3070_v4  ;;  %3827 = vmatpush3.msra.mxu0 %v3070_v4  ;;  %v4875_v28 = vld [vmem:[%s4834_s26 + $0x21] sm:$0xff]  ;;  %v4893_v33 = vld [vmem:[%s4834_s26 + $0x31] sm:$0xff]  ;;  %v4903_v36 = vld [vmem:[%s4834_s26 + $0x39] sm:$0xff] }
  0x1f   : > { %4543 = vmatprep.subr.mxu1 %v3069_v5  ;;  %3828 = vmatprep.subr.mxu0 %v3069_v5  ;;  %v3088_v29 = vld [vmem:[%s6404_s1 + $0x168] sm:$0xff]  ;;  %v231_v30 = vld [vmem:[%s6404_s1 + $0x60] sm:$0xff]  ;;  %v230_v35 = vld [vmem:[%s6404_s1 + $0x58] sm:$0xff] }
  0x20   : > { %4559 = vmatpush3.msra.mxu1 %v3069_v5  ;;  %3829 = vmatpush3.msra.mxu0 %v3069_v5  ;;  %v3087_v32 = vld [vmem:[%s6404_s1 + $0x160] sm:$0xff]  ;;  %v3086_v37 = vld [vmem:[%s6404_s1 + $0x158] sm:$0xff]  ;;  %v229_v38 = vld [vmem:[%s6404_s1 + $0x50] sm:$0xff] }
  0x21   : > { %4544 = vmatprep.subr.mxu1 %v3068_v6  ;;  %3830 = vmatprep.subr.mxu0 %v3068_v6  ;;  %v4914_v39 = vld [vmem:[%s4834_s26 + $0x109] sm:$0xff]  ;;  %v4924_v42 = vld [vmem:[%s4834_s26 + $0x111] sm:$0xff]  ;;  %v227_v46 = vld [vmem:[%s6404_s1 + $0x40] sm:$0xff] }
  0x22   : > { %4560 = vmatpush3.msra.mxu1 %v3068_v6  ;;  %3831 = vmatpush3.msra.mxu0 %v3068_v6  ;;  %v3085_v40 = vld [vmem:[%s6404_s1 + $0x150] sm:$0xff]  ;;  %v228_v43 = vld [vmem:[%s6404_s1 + $0x48] sm:$0xff]  ;;  %v3083_v48 = vld [vmem:[%s6404_s1 + $0x140] sm:$0xff] }
  0x23   : > { %4545 = vmatprep.subr.mxu1 %v3067_v7  ;;  %3832 = vmatprep.subr.mxu0 %v3067_v7  ;;  %v4921_v41 = vld [vmem:[%s4834_s26 + $0x49] sm:$0xff]  ;;  %v4931_v44 = vld [vmem:[%s4834_s26 + $0x51] sm:$0xff]  ;;  %v4942_v47 = vld [vmem:[%s4834_s26 + $0x121] sm:$0xff] }
  0x24   : > { %4561 = vmatpush3.msra.mxu1 %v3067_v7  ;;  %3833 = vmatpush3.msra.mxu0 %v3067_v7  ;;  %v3084_v45 = vld [vmem:[%s6404_s1 + $0x148] sm:$0xff]  ;;  %v226_v51 = vld [vmem:[%s6404_s1 + $0x38] sm:$0xff]  ;;  %v225_v54 = vld [vmem:[%s6404_s1 + $0x30] sm:$0xff] }
  0x25   : > { %4546 = vmatprep.subr.mxu1 %v3066_v8  ;;  %3834 = vmatprep.subr.mxu0 %v3066_v8  ;;  %v4949_v49 = vld [vmem:[%s4834_s26 + $0x61] sm:$0xff]  ;;  %v4952_v50 = vld [vmem:[%s4834_s26 + $0x129] sm:$0xff]  ;;  %v3082_v53 = vld [vmem:[%s6404_s1 + $0x138] sm:$0xff] }
  0x26   : > { %4562 = vmatpush3.msra.mxu1 %v3066_v8  ;;  %3835 = vmatpush3.msra.mxu0 %v3066_v8  ;;  %v4959_v52 = vld [vmem:[%s4834_s26 + $0x69] sm:$0xff]  ;;  %v4970_v55 = vld [vmem:[%s4834_s26 + $0x139] sm:$0xff]  ;;  %v4980_v58 = vld [vmem:[%s4834_s26 + $0x141] sm:$0xff] }
  0x27   : > { %4547 = vmatprep.subr.mxu1 %v3065_v9  ;;  %3836 = vmatprep.subr.mxu0 %v3065_v9  ;;  %v3081_v56 = vld [vmem:[%s6404_s1 + $0x130] sm:$0xff]  ;;  %v4977_v57 = vld [vmem:[%s4834_s26 + $0x79] sm:$0xff]  ;;  %v224_v59 = vld [vmem:[%s6404_s1 + $0x28] sm:$0xff] }
  0x28   : > { %4563 = vmatpush3.msra.mxu1 %v3065_v9  ;;  %3837 = vmatpush3.msra.mxu0 %v3065_v9  ;;  %v4987_v60 = vld [vmem:[%s4834_s26 + $0x81] sm:$0xff]  ;;  %v4998_v63 = vld [vmem:[%s4834_s26 + $0x151] sm:$0xff]  ;;  %v5008_v2 = vld [vmem:[%s4834_s26 + $0x159] sm:$0xff] }
  0x29   : > { %4548 = vmatprep.subr.mxu1 %v3064_v10  ;;  %3838 = vmatprep.subr.mxu0 %v3064_v10  ;;  %v3080_v61 = vld [vmem:[%s6404_s1 + $0x128] sm:$0xff]  ;;  %v223_v62 = vld [vmem:[%s6404_s1 + $0x20] sm:$0xff]  ;;  %v5005_v1 = vld [vmem:[%s4834_s26 + $0x91] sm:$0xff]  ;;  %6439 = vst [vmem:[#allocation5_spill] sm:$0xff] %v5008_v2 }
  0x2a   : > { %4564 = vmatpush3.msra.mxu1 %v3064_v10  ;;  %3839 = vmatpush3.msra.mxu0 %v3064_v10  ;;  %v3079_v0 = vld [vmem:[%s6404_s1 + $0x120] sm:$0xff]  ;;  %v222_v3 = vld [vmem:[%s6404_s1 + $0x18] sm:$0xff]  ;;  %v221_v6 = vld [vmem:[%s6404_s1 + $0x10] sm:$0xff] }
  0x2b   : > { %4549 = vmatprep.subr.mxu1 %v3063_v11  ;;  %3840 = vmatprep.subr.mxu0 %v3063_v11  ;;  %v5015_v4 = vld [vmem:[%s4834_s26 + $0x99] sm:$0xff]  ;;  %v5026_v7 = vld [vmem:[%s4834_s26 + $0x169] sm:$0xff]  ;;  %v5036_v10 = vld [vmem:[%s4834_s26 + $0x171] sm:$0xff] }
  0x2c   : > { %4565 = vmatpush3.msra.mxu1 %v3063_v11  ;;  %3841 = vmatpush3.msra.mxu0 %v3063_v11  ;;  %v3078_v5 = vld [vmem:[%s6404_s1 + $0x118] sm:$0xff]  ;;  %6440 = vst [vmem:[#allocation6_spill] sm:$0xff] %v5026_v7  ;;  %v3077_v8 = vld [vmem:[%s6404_s1 + $0x110] sm:$0xff]  ;;  %6441 = vst [vmem:[#allocation7_spill] sm:$0xff] %v5036_v10 }
  0x2d   : > { %4550 = vmatprep.subr.mxu1 %v3062_v12  ;;  %3842 = vmatprep.subr.mxu0 %v3062_v12  ;;  %v5033_v9 = vld [vmem:[%s4834_s26 + $0xa9] sm:$0xff] }
  0x2e   : > { %4566 = vmatpush3.msra.mxu1 %v3062_v12  ;;  %3843 = vmatpush3.msra.mxu0 %v3062_v12  ;;  %v220_v11 = vld [vmem:[%s6404_s1 + $0x8] sm:$0xff]  ;;  %v5043_v12 = vld [vmem:[%s4834_s26 + $0xb1] sm:$0xff] }
  0x2f   : > { %4551 = vmatprep.subr.mxu1 %v3061_v13  ;;  %3844 = vmatprep.subr.mxu0 %v3061_v13 }
  0x30   : > { %4567 = vmatpush3.msra.mxu1 %v3061_v13  ;;  %3845 = vmatpush3.msra.mxu0 %v3061_v13  ;;  %v3076_v13 = vld [vmem:[%s6404_s1 + $0x108] sm:$0xff] }
  0x31   : > { %4552 = vmatprep.subr.mxu1 %v3060_v14  ;;  %3846 = vmatprep.subr.mxu0 %v3060_v14 }
  0x32   : > { %4568 = vmatpush3.msra.mxu1 %v3060_v14  ;;  %3847 = vmatpush3.msra.mxu0 %v3060_v14  ;;  %v219_v14 = vld [vmem:[%s6404_s1] sm:$0xff] }
  0x33   : > { %4553 = vmatprep.subr.mxu1 %v3059_v15  ;;  %3848 = vmatprep.subr.mxu0 %v3059_v15 }
  0x34   : > { %4569 = vmatpush3.msra.mxu1 %v3059_v15  ;;  %3874 = vmatprep.mubr.f32.mxu1 %v4840_v16 }
  0x35   : > { %3849 = vmatpush3.msra.mxu0 %v3059_v15  ;;  %3850 = vmatprep.mubr.f32.mxu0 %v235_v17  ;;  %v187_v15 = vld [vmem:[%s4834_s26] sm:$0xff] }
  0x36   : > { %3875 = vmatmul.mubr.f32.vlgmr.msra.gmra.mxu1 %v4844_v18  ;;  %3898 = vmatprep.subr.mxu1 %v234_v19  ;;  %v3075_v17 = vld [vmem:[%s6404_s1 + $0x100] sm:$0xff] }
  0x37   : > { %3851 = vmatmul.mubr.f32.vlgmr.msra.gmra.mxu0 %v236_v20  ;;  %3899 = vmatpush3.msra.mxu1 %v234_v19  ;;  %v188_v19 = vld [vmem:[%s4834_s26 + $0x8] sm:$0xff] }
  0x38   : > { %3978 = vmatprep.subr.mxu0 %v3090_v21  ;;  %3900 = vmatprep.subr.mxu1 %v233_v22  ;;  %v734_v20 = vld [vmem:[%s4834_s26 + $0x2] sm:$0xff] }
  0x39   : > { %3979 = vmatpush3.msra.mxu0 %v3090_v21  ;;  %3877 = vmatprep.mubr.f32.mxu1 %v4859_v23  ;;  %v3138_v21 = vld [vmem:[%s6404_s1 + $0x1f8] sm:$0xff] }
  0x3a   : > { %3901 = vmatpush3.msra.mxu1 %v233_v22  ;;  %3980 = vmatprep.subr.mxu0 %v3089_v24  ;;  %v735_v22 = vld [vmem:[%s4834_s26 + $0xa] sm:$0xff] }
  0x3b   : > { %3853 = vmatprep.mubr.f32.mxu0 %v4865_v25  ;;  %3878 = vmatmul.mubr.f32.gmra.mxu1 %v4868_v26 }
  0x3c   : > { %3902 = vmatprep.subr.mxu1 %v232_v27  ;;  %3981 = vmatpush3.msra.mxu0 %v3089_v24  ;;  %v3186_v24 = vld [vmem:[%s6404_s1 + $0x278] sm:$0xff] }
  0x3d   : > { %3854 = vmatmul.mubr.f32.gmra.mxu0 %v4875_v28  ;;  %3903 = vmatpush3.msra.mxu1 %v232_v27  ;;  %v5068_v27 = vld [vmem:[%s4834_s26 + $0x18] sm:$0xff] }
  0x3e   : > { %3982 = vmatprep.subr.mxu0 %v3088_v29  ;;  %3904 = vmatprep.subr.mxu1 %v231_v30 }
  0x3f   : > { %3983 = vmatpush3.msra.mxu0 %v3088_v29  ;;  %3880 = vmatprep.mubr.f32.mxu1 %v4886_v31  ;;  %v5071_v29 = vld [vmem:[%s4834_s26 + $0x20] sm:$0xff] }
  0x40   : > { %3905 = vmatpush3.msra.mxu1 %v231_v30  ;;  %3984 = vmatprep.subr.mxu0 %v3087_v32  ;;  %v5074_v30 = vld [vmem:[%s4834_s26 + $0x1a] sm:$0xff] }
  0x41   : > { %3856 = vmatprep.mubr.f32.mxu0 %v4893_v33  ;;  %3881 = vmatmul.mubr.f32.gmra.mxu1 %v4896_v34  ;;  %6442 = vst [vmem:[#allocation8_spill] sm:$0xff] %v5074_v30 }
  0x42   : > { %3906 = vmatprep.subr.mxu1 %v230_v35  ;;  %3985 = vmatpush3.msra.mxu0 %v3087_v32  ;;  %v3137_v32 = vld [vmem:[%s6404_s1 + $0x1f0] sm:$0xff] }
  0x43   : > { %3857 = vmatmul.mubr.f32.gmra.mxu0 %v4903_v36  ;;  %3907 = vmatpush3.msra.mxu1 %v230_v35  ;;  %v5081_v35 = vld [vmem:[%s4834_s26 + $0x22] sm:$0xff] }
  0x44   : > { %3986 = vmatprep.subr.mxu0 %v3086_v37  ;;  %3908 = vmatprep.subr.mxu1 %v229_v38  ;;  %6443 = vst [vmem:[#allocation9_spill] sm:$0xff] %v5081_v35 }
  0x45   : > { %3987 = vmatpush3.msra.mxu0 %v3086_v37  ;;  %3883 = vmatprep.mubr.f32.mxu1 %v4914_v39  ;;  %v3185_v37 = vld [vmem:[%s6404_s1 + $0x270] sm:$0xff] }
  0x46   : > { %3909 = vmatpush3.msra.mxu1 %v229_v38  ;;  %3988 = vmatprep.subr.mxu0 %v3085_v40  ;;  %v5088_v38 = vld [vmem:[%s4834_s26 + $0x30] sm:$0xff] }
  0x47   : > { %3859 = vmatprep.mubr.f32.mxu0 %v4921_v41  ;;  %3884 = vmatmul.mubr.f32.gmra.mxu1 %v4924_v42 }
  0x48   : > { %3910 = vmatprep.subr.mxu1 %v228_v43  ;;  %3989 = vmatpush3.msra.mxu0 %v3085_v40  ;;  %v5092_v40 = vld [vmem:[%s4834_s26 + $0x38] sm:$0xff] }
  0x49   : > { %3860 = vmatmul.mubr.f32.gmra.mxu0 %v4931_v44  ;;  %3911 = vmatpush3.msra.mxu1 %v228_v43  ;;  %v5096_v43 = vld [vmem:[%s4834_s26 + $0x32] sm:$0xff] }
  0x4a   : > { %3990 = vmatprep.subr.mxu0 %v3084_v45  ;;  %3912 = vmatprep.subr.mxu1 %v227_v46  ;;  %6444 = vst [vmem:[#allocation10_spill] sm:$0xff] %v5096_v43 }
  0x4b   : > { %3991 = vmatpush3.msra.mxu0 %v3084_v45  ;;  %3886 = vmatprep.mubr.f32.mxu1 %v4942_v47  ;;  %v3136_v45 = vld [vmem:[%s6404_s1 + $0x1e8] sm:$0xff] }
  0x4c   : > { %3913 = vmatpush3.msra.mxu1 %v227_v46  ;;  %3992 = vmatprep.subr.mxu0 %v3083_v48  ;;  %v5103_v46 = vld [vmem:[%s4834_s26 + $0x3a] sm:$0xff] }
  0x4d   : > { %3862 = vmatprep.mubr.f32.mxu0 %v4949_v49  ;;  %3887 = vmatmul.mubr.f32.gmra.mxu1 %v4952_v50  ;;  %6445 = vst [vmem:[#allocation11_spill] sm:$0xff] %v5103_v46 }
  0x4e   : > { %3914 = vmatprep.subr.mxu1 %v226_v51  ;;  %3993 = vmatpush3.msra.mxu0 %v3083_v48  ;;  %v3184_v48 = vld [vmem:[%s6404_s1 + $0x268] sm:$0xff] }
  0x4f   : > { %3863 = vmatmul.mubr.f32.gmra.mxu0 %v4959_v52  ;;  %3915 = vmatpush3.msra.mxu1 %v226_v51  ;;  %v5110_v51 = vld [vmem:[%s4834_s26 + $0x48] sm:$0xff] }
  0x50   : > { %3994 = vmatprep.subr.mxu0 %v3082_v53  ;;  %3916 = vmatprep.subr.mxu1 %v225_v54 }
  0x51   : > { %3995 = vmatpush3.msra.mxu0 %v3082_v53  ;;  %3889 = vmatprep.mubr.f32.mxu1 %v4970_v55  ;;  %v5114_v53 = vld [vmem:[%s4834_s26 + $0x50] sm:$0xff] }
  0x52   : > { %3917 = vmatpush3.msra.mxu1 %v225_v54  ;;  %3996 = vmatprep.subr.mxu0 %v3081_v56  ;;  %v5118_v54 = vld [vmem:[%s4834_s26 + $0x4a] sm:$0xff] }
  0x53   : > { %3865 = vmatprep.mubr.f32.mxu0 %v4977_v57  ;;  %3890 = vmatmul.mubr.f32.gmra.mxu1 %v4980_v58  ;;  %6446 = vst [vmem:[#allocation12_spill] sm:$0xff] %v5118_v54 }
  0x54   : > { %3918 = vmatprep.subr.mxu1 %v224_v59  ;;  %3997 = vmatpush3.msra.mxu0 %v3081_v56  ;;  %v3135_v56 = vld [vmem:[%s6404_s1 + $0x1e0] sm:$0xff] }
  0x55   : > { %3866 = vmatmul.mubr.f32.gmra.mxu0 %v4987_v60  ;;  %3919 = vmatpush3.msra.mxu1 %v224_v59  ;;  %v5125_v59 = vld [vmem:[%s4834_s26 + $0x52] sm:$0xff] }
  0x56   : > { %3998 = vmatprep.subr.mxu0 %v3080_v61  ;;  %3920 = vmatprep.subr.mxu1 %v223_v62  ;;  %6447 = vst [vmem:[#allocation13_spill] sm:$0xff] %v5125_v59 }
  0x57   : > { %3999 = vmatpush3.msra.mxu0 %v3080_v61  ;;  %3892 = vmatprep.mubr.f32.mxu1 %v4998_v63  ;;  %v3183_v61 = vld [vmem:[%s6404_s1 + $0x260] sm:$0xff] }
  0x58   : > { %3921 = vmatpush3.msra.mxu1 %v223_v62  ;;  %4000 = vmatprep.subr.mxu0 %v3079_v0  ;;  %v5132_v62 = vld [vmem:[%s4834_s26 + $0x60] sm:$0xff] }
  0x59   : > { %3868 = vmatprep.mubr.f32.mxu0 %v5005_v1  ;;  %3893 = vmatmul.mubr.f32.gmra.mxu1 %v5008_v2  ;;  %v5389_v2 = vld [vmem:[%s4834_s26 + $0x172] sm:$0xff] }
  0x5a   : > { %3922 = vmatprep.subr.mxu1 %v222_v3  ;;  %4001 = vmatpush3.msra.mxu0 %v3079_v0  ;;  %v5136_v0 = vld [vmem:[%s4834_s26 + $0x68] sm:$0xff] }
  0x5b   : > { %3869 = vmatmul.mubr.f32.gmra.mxu0 %v5015_v4  ;;  %3923 = vmatpush3.msra.mxu1 %v222_v3  ;;  %v5140_v3 = vld [vmem:[%s4834_s26 + $0x62] sm:$0xff] }
  0x5c   : > { %4002 = vmatprep.subr.mxu0 %v3078_v5  ;;  %3924 = vmatprep.subr.mxu1 %v221_v6  ;;  %6448 = vst [vmem:[#allocation14_spill] sm:$0xff] %v5140_v3 }
  0x5d   : > { %4003 = vmatpush3.msra.mxu0 %v3078_v5  ;;  %3895 = vmatprep.mubr.f32.mxu1 %v5026_v7  ;;  %v3134_v5 = vld [vmem:[%s6404_s1 + $0x1d8] sm:$0xff]  ;;  %v5382_v7 = vld [vmem:[%s4834_s26 + $0x16a] sm:$0xff] }
  0x5e   : > { %3925 = vmatpush3.msra.mxu1 %v221_v6  ;;  %4004 = vmatprep.subr.mxu0 %v3077_v8  ;;  %v5147_v6 = vld [vmem:[%s4834_s26 + $0x6a] sm:$0xff] }
  0x5f   : > { %3871 = vmatprep.mubr.f32.mxu0 %v5033_v9  ;;  %3896 = vmatmul.mubr.f32.gmra.mxu1 %v5036_v10  ;;  %6449 = vst [vmem:[#allocation15_spill] sm:$0xff] %v5147_v6  ;;  %v5367_v10 = vld [vmem:[%s4834_s26 + $0x15a] sm:$0xff] }
  0x60   : > { %3926 = vmatprep.subr.mxu1 %v220_v11  ;;  %4005 = vmatpush3.msra.mxu0 %v3077_v8  ;;  %v3182_v8 = vld [vmem:[%s6404_s1 + $0x258] sm:$0xff] }
  0x61   : > { %3872 = vmatmul.mubr.f32.gmra.mxu0 %v5043_v12  ;;  %3927 = vmatpush3.msra.mxu1 %v220_v11  ;;  %v5154_v11 = vld [vmem:[%s4834_s26 + $0x78] sm:$0xff] }
  0x62   : > { %4006 = vmatprep.subr.mxu0 %v3076_v13  ;;  %3928 = vmatprep.subr.mxu1 %v219_v14 }
  0x63   : > { %4007 = vmatpush3.msra.mxu0 %v3076_v13  ;;  %3929 = vmatpush3.msra.mxu1 %v219_v14  ;;  %v5158_v13 = vld [vmem:[%s4834_s26 + $0x80] sm:$0xff] }
  0x64   : > { %3930 = vmatprep.mubr.f32.mxu1 %v187_v15  ;;  %4008 = vmatprep.subr.mxu0 %v3075_v17  ;;  %v5162_v14 = vld [vmem:[%s4834_s26 + $0x7a] sm:$0xff]  ;;  %v3133_v15 = vld [vmem:[%s6404_s1 + $0x1d0] sm:$0xff] }
  0x65   : > { %3931 = vmatmul.mubr.f32.vlgmr.msra.gmra.mxu1 %v188_v19  ;;  %4009 = vmatpush3.msra.mxu0 %v3075_v17  ;;  %6450 = vst [vmem:[#allocation16_spill] sm:$0xff] %v5162_v14  ;;  %v5169_v17 = vld [vmem:[%s4834_s26 + $0x82] sm:$0xff]  ;;  %v3181_v19 = vld [vmem:[%s6404_s1 + $0x250] sm:$0xff] }
  0x66   : > { %4010 = vmatprep.mubr.f32.mxu0 %v734_v20  ;;  %4058 = vmatprep.subr.mxu1 %v3138_v21  ;;  %6451 = vst [vmem:[#allocation17_spill] sm:$0xff] %v5169_v17  ;;  %v5176_v20 = vld [vmem:[%s4834_s26 + $0x90] sm:$0xff] }
  0x67   : > { %4011 = vmatmul.mubr.f32.vlgmr.msra.gmra.mxu0 %v735_v22  ;;  %4059 = vmatpush3.msra.mxu1 %v3138_v21  ;;  %v5180_v21 = vld [vmem:[%s4834_s26 + $0x98] sm:$0xff] }
  0x68   : > { %4138 = vmatprep.subr.mxu0 %v3186_v24  ;;  %3933 = vmatprep.mubr.f32.mxu1 %v5068_v27  ;;  %v5184_v22 = vld [vmem:[%s4834_s26 + $0x92] sm:$0xff] }
  0x69   : > { %4139 = vmatpush3.msra.mxu0 %v3186_v24  ;;  %3934 = vmatmul.mubr.f32.gmra.mxu1 %v5071_v29  ;;  %6452 = vst [vmem:[#allocation18_spill] sm:$0xff] %v5184_v22  ;;  %v3132_v24 = vld [vmem:[%s6404_s1 + $0x1c8] sm:$0xff] }
  0x6a   : > { %4013 = vmatprep.mubr.f32.mxu0 %v5074_v30  ;;  %4060 = vmatprep.subr.mxu1 %v3137_v32  ;;  %v3124_v30 = vld [vmem:[%s6404_s1 + $0x188] sm:$0xff] }
  0x6b   : > { %4014 = vmatmul.mubr.f32.gmra.mxu0 %v5081_v35  ;;  %4061 = vmatpush3.msra.mxu1 %v3137_v32  ;;  %v5191_v32 = vld [vmem:[%s4834_s26 + $0x9a] sm:$0xff]  ;;  %v5345_v35 = vld [vmem:[%s4834_s26 + $0x142] sm:$0xff] }
  0x6c   : > { %4140 = vmatprep.subr.mxu0 %v3185_v37  ;;  %3936 = vmatprep.mubr.f32.mxu1 %v5088_v38  ;;  %6453 = vst [vmem:[#allocation19_spill] sm:$0xff] %v5191_v32  ;;  %6467 = vst [vmem:[#allocation33_spill] sm:$0xff] %v5345_v35 }
  0x6d   : > { %4141 = vmatpush3.msra.mxu0 %v3185_v37  ;;  %3937 = vmatmul.mubr.f32.gmra.mxu1 %v5092_v40  ;;  %v3180_v37 = vld [vmem:[%s6404_s1 + $0x248] sm:$0xff] }
  0x6e   : > { %4016 = vmatprep.mubr.f32.mxu0 %v5096_v43  ;;  %4062 = vmatprep.subr.mxu1 %v3136_v45  ;;  %v3125_v43 = vld [vmem:[%s6404_s1 + $0x190] sm:$0xff] }
  0x6f   : > { %4017 = vmatmul.mubr.f32.gmra.mxu0 %v5103_v46  ;;  %4063 = vmatpush3.msra.mxu1 %v3136_v45  ;;  %v5198_v45 = vld [vmem:[%s4834_s26 + $0xa8] sm:$0xff] }
  0x70   : > { %4142 = vmatprep.subr.mxu0 %v3184_v48  ;;  %3939 = vmatprep.mubr.f32.mxu1 %v5110_v51  ;;  %v5323_v46 = vld [vmem:[%s4834_s26 + $0x12a] sm:$0xff] }
  0x71   : > { %4143 = vmatpush3.msra.mxu0 %v3184_v48  ;;  %3940 = vmatmul.mubr.f32.gmra.mxu1 %v5114_v53  ;;  %v5202_v48 = vld [vmem:[%s4834_s26 + $0xb0] sm:$0xff]  ;;  %6465 = vst [vmem:[#allocation31_spill] sm:$0xff] %v5323_v46 }
  0x72   : > { %4019 = vmatprep.mubr.f32.mxu0 %v5118_v54  ;;  %4064 = vmatprep.subr.mxu1 %v3135_v56  ;;  %v3126_v54 = vld [vmem:[%s6404_s1 + $0x198] sm:$0xff] }
  0x73   : > { %4020 = vmatmul.mubr.f32.gmra.mxu0 %v5125_v59  ;;  %4065 = vmatpush3.msra.mxu1 %v3135_v56  ;;  %v5206_v56 = vld [vmem:[%s4834_s26 + $0xaa] sm:$0xff]  ;;  %v5301_v59 = vld [vmem:[%s4834_s26 + $0x112] sm:$0xff] }
  0x74   : > { %4144 = vmatprep.subr.mxu0 %v3183_v61  ;;  %3942 = vmatprep.mubr.f32.mxu1 %v5132_v62  ;;  %6454 = vst [vmem:[#allocation20_spill] sm:$0xff] %v5206_v56  ;;  %6463 = vst [vmem:[#allocation29_spill] sm:$0xff] %v5301_v59 }
  0x75   : > { %4145 = vmatpush3.msra.mxu0 %v3183_v61  ;;  %3943 = vmatmul.mubr.f32.gmra.mxu1 %v5136_v0  ;;  %v3131_v61 = vld [vmem:[%s6404_s1 + $0x1c0] sm:$0xff] }
  0x76   : > { %4022 = vmatprep.mubr.f32.mxu0 %v5140_v3  ;;  %4066 = vmatprep.subr.mxu1 %v3134_v5  ;;  %v3127_v3 = vld [vmem:[%s6404_s1 + $0x1a0] sm:$0xff] }
  0x77   : > { %4023 = vmatmul.mubr.f32.gmra.mxu0 %v5147_v6  ;;  %4067 = vmatpush3.msra.mxu1 %v3134_v5  ;;  %v5213_v5 = vld [vmem:[%s4834_s26 + $0xb2] sm:$0xff]  ;;  %v5279_v6 = vld [vmem:[%s4834_s26 + $0xfa] sm:$0xff] }
  0x78   : > { %4146 = vmatprep.subr.mxu0 %v3182_v8  ;;  %3945 = vmatprep.mubr.f32.mxu1 %v5154_v11  ;;  %6455 = vst [vmem:[#allocation21_spill] sm:$0xff] %v5213_v5  ;;  %6461 = vst [vmem:[#allocation27_spill] sm:$0xff] %v5279_v6 }
  0x79   : > { %4147 = vmatpush3.msra.mxu0 %v3182_v8  ;;  %3946 = vmatmul.mubr.f32.gmra.mxu1 %v5158_v13  ;;  %v3179_v8 = vld [vmem:[%s6404_s1 + $0x240] sm:$0xff] }
  0x7a   : > { %4025 = vmatprep.mubr.f32.mxu0 %v5162_v14  ;;  %4068 = vmatprep.subr.mxu1 %v3133_v15  ;;  %v3128_v14 = vld [vmem:[%s6404_s1 + $0x1a8] sm:$0xff] }
  0x7b   : > { %4026 = vmatmul.mubr.f32.gmra.mxu0 %v5169_v17  ;;  %4069 = vmatpush3.msra.mxu1 %v3133_v15  ;;  %v5220_v15 = vld [vmem:[%s4834_s26 + $0xc0] sm:$0xff] }
  0x7c   : > { %4148 = vmatprep.subr.mxu0 %v3181_v19  ;;  %3948 = vmatprep.mubr.f32.mxu1 %v5176_v20  ;;  %v5257_v17 = vld [vmem:[%s4834_s26 + $0xe2] sm:$0xff] }
  0x7d   : > { %4149 = vmatpush3.msra.mxu0 %v3181_v19  ;;  %3949 = vmatmul.mubr.f32.gmra.mxu1 %v5180_v21  ;;  %v5224_v19 = vld [vmem:[%s4834_s26 + $0xc8] sm:$0xff]  ;;  %6459 = vst [vmem:[#allocation25_spill] sm:$0xff] %v5257_v17 }
  0x7e   : > { %4028 = vmatprep.mubr.f32.mxu0 %v5184_v22  ;;  %4070 = vmatprep.subr.mxu1 %v3132_v24  ;;  %v3129_v22 = vld [vmem:[%s6404_s1 + $0x1b0] sm:$0xff] }
  0x7f   : > { %4029 = vmatmul.mubr.f32.gmra.mxu0 %v5191_v32  ;;  %4071 = vmatpush3.msra.mxu1 %v3132_v24  ;;  %v5228_v24 = vld [vmem:[%s4834_s26 + $0xc2] sm:$0xff]  ;;  %v5235_v32 = vld [vmem:[%s4834_s26 + $0xca] sm:$0xff] }
  0x80   : > { %4150 = vmatprep.subr.mxu0 %v3180_v37  ;;  %3951 = vmatprep.mubr.f32.mxu1 %v5198_v45  ;;  %6456 = vst [vmem:[#allocation22_spill] sm:$0xff] %v5228_v24  ;;  %6457 = vst [vmem:[#allocation23_spill] sm:$0xff] %v5235_v32 }
  0x81   : > { %4151 = vmatpush3.msra.mxu0 %v3180_v37  ;;  %3952 = vmatmul.mubr.f32.gmra.mxu1 %v5202_v48  ;;  %v3130_v37 = vld [vmem:[%s6404_s1 + $0x1b8] sm:$0xff] }
  0x82   : > { %4031 = vmatprep.mubr.f32.mxu0 %v5206_v56  ;;  %4072 = vmatprep.subr.mxu1 %v3131_v61  ;;  %v5246_v56 = vld [vmem:[%s4834_s26 + $0xe0] sm:$0xff] }
  0x83   : > { %4032 = vmatmul.mubr.f32.gmra.mxu0 %v5213_v5  ;;  %4073 = vmatpush3.msra.mxu1 %v3131_v61  ;;  %v3178_v61 = vld [vmem:[%s6404_s1 + $0x238] sm:$0xff] }
  0x84   : > { %4152 = vmatprep.subr.mxu0 %v3179_v8  ;;  %3954 = vmatprep.mubr.f32.mxu1 %v5220_v15  ;;  %v5242_v5 = vld [vmem:[%s4834_s26 + $0xd8] sm:$0xff] }
  0x85   : > { %4153 = vmatpush3.msra.mxu0 %v3179_v8  ;;  %3955 = vmatmul.mubr.f32.gmra.mxu1 %v5224_v19  ;;  %v5250_v8 = vld [vmem:[%s4834_s26 + $0xda] sm:$0xff] }
  0x86   : > { %4034 = vmatprep.mubr.f32.mxu0 %v5228_v24  ;;  %4074 = vmatprep.subr.mxu1 %v3130_v37  ;;  %6458 = vst [vmem:[#allocation24_spill] sm:$0xff] %v5250_v8  ;;  %v5268_v24 = vld [vmem:[%s4834_s26 + $0xf8] sm:$0xff] }
  0x87   : > { %4035 = vmatmul.mubr.f32.gmra.mxu0 %v5235_v32  ;;  %4075 = vmatpush3.msra.mxu1 %v3130_v37  ;;  %v3177_v37 = vld [vmem:[%s6404_s1 + $0x230] sm:$0xff] }
  0x88   : > { %4154 = vmatprep.subr.mxu0 %v3178_v61  ;;  %3957 = vmatprep.mubr.f32.mxu1 %v5242_v5  ;;  %v5264_v32 = vld [vmem:[%s4834_s26 + $0xf0] sm:$0xff] }
  0x89   : > { %4155 = vmatpush3.msra.mxu0 %v3178_v61  ;;  %3958 = vmatmul.mubr.f32.gmra.mxu1 %v5246_v56  ;;  %v5272_v61 = vld [vmem:[%s4834_s26 + $0xf2] sm:$0xff] }
  0x8a   : > { %4037 = vmatprep.mubr.f32.mxu0 %v5250_v8  ;;  %4076 = vmatprep.subr.mxu1 %v3129_v22  ;;  %6460 = vst [vmem:[#allocation26_spill] sm:$0xff] %v5272_v61  ;;  %v5290_v8 = vld [vmem:[%s4834_s26 + $0x110] sm:$0xff] }
  0x8b   : > { %4038 = vmatmul.mubr.f32.gmra.mxu0 %v5257_v17  ;;  %4077 = vmatpush3.msra.mxu1 %v3129_v22  ;;  %v3176_v22 = vld [vmem:[%s6404_s1 + $0x228] sm:$0xff] }
  0x8c   : > { %4156 = vmatprep.subr.mxu0 %v3177_v37  ;;  %3960 = vmatprep.mubr.f32.mxu1 %v5264_v32  ;;  %v5286_v17 = vld [vmem:[%s4834_s26 + $0x108] sm:$0xff] }
  0x8d   : > { %4157 = vmatpush3.msra.mxu0 %v3177_v37  ;;  %3961 = vmatmul.mubr.f32.gmra.mxu1 %v5268_v24  ;;  %v5294_v37 = vld [vmem:[%s4834_s26 + $0x10a] sm:$0xff] }
  0x8e   : > { %4040 = vmatprep.mubr.f32.mxu0 %v5272_v61  ;;  %4078 = vmatprep.subr.mxu1 %v3128_v14  ;;  %6462 = vst [vmem:[#allocation28_spill] sm:$0xff] %v5294_v37  ;;  %v5312_v61 = vld [vmem:[%s4834_s26 + $0x128] sm:$0xff] }
  0x8f   : > { %4041 = vmatmul.mubr.f32.gmra.mxu0 %v5279_v6  ;;  %4079 = vmatpush3.msra.mxu1 %v3128_v14  ;;  %v3175_v14 = vld [vmem:[%s6404_s1 + $0x220] sm:$0xff] }
  0x90   : > { %4158 = vmatprep.subr.mxu0 %v3176_v22  ;;  %3963 = vmatprep.mubr.f32.mxu1 %v5286_v17  ;;  %v5308_v6 = vld [vmem:[%s4834_s26 + $0x120] sm:$0xff] }
  0x91   : > { %4159 = vmatpush3.msra.mxu0 %v3176_v22  ;;  %3964 = vmatmul.mubr.f32.gmra.mxu1 %v5290_v8  ;;  %v5316_v22 = vld [vmem:[%s4834_s26 + $0x122] sm:$0xff] }
  0x92   : > { %4043 = vmatprep.mubr.f32.mxu0 %v5294_v37  ;;  %4080 = vmatprep.subr.mxu1 %v3127_v3  ;;  %6464 = vst [vmem:[#allocation30_spill] sm:$0xff] %v5316_v22  ;;  %v5334_v37 = vld [vmem:[%s4834_s26 + $0x140] sm:$0xff] }
  0x93   : > { %4044 = vmatmul.mubr.f32.gmra.mxu0 %v5301_v59  ;;  %4081 = vmatpush3.msra.mxu1 %v3127_v3  ;;  %v3174_v3 = vld [vmem:[%s6404_s1 + $0x218] sm:$0xff] }
  0x94   : > { %4160 = vmatprep.subr.mxu0 %v3175_v14  ;;  %3966 = vmatprep.mubr.f32.mxu1 %v5308_v6  ;;  %v5330_v59 = vld [vmem:[%s4834_s26 + $0x138] sm:$0xff] }
  0x95   : > { %4161 = vmatpush3.msra.mxu0 %v3175_v14  ;;  %3967 = vmatmul.mubr.f32.gmra.mxu1 %v5312_v61  ;;  %v5338_v14 = vld [vmem:[%s4834_s26 + $0x13a] sm:$0xff] }
  0x96   : > { %4046 = vmatprep.mubr.f32.mxu0 %v5316_v22  ;;  %4082 = vmatprep.subr.mxu1 %v3126_v54  ;;  %6466 = vst [vmem:[#allocation32_spill] sm:$0xff] %v5338_v14  ;;  %v5356_v22 = vld [vmem:[%s4834_s26 + $0x158] sm:$0xff] }
  0x97   : > { %4047 = vmatmul.mubr.f32.gmra.mxu0 %v5323_v46  ;;  %4083 = vmatpush3.msra.mxu1 %v3126_v54  ;;  %v3173_v54 = vld [vmem:[%s6404_s1 + $0x210] sm:$0xff] }
  0x98   : > { %4162 = vmatprep.subr.mxu0 %v3174_v3  ;;  %3969 = vmatprep.mubr.f32.mxu1 %v5330_v59  ;;  %v5352_v46 = vld [vmem:[%s4834_s26 + $0x150] sm:$0xff] }
  0x99   : > { %4163 = vmatpush3.msra.mxu0 %v3174_v3  ;;  %3970 = vmatmul.mubr.f32.gmra.mxu1 %v5334_v37  ;;  %v5360_v3 = vld [vmem:[%s4834_s26 + $0x152] sm:$0xff] }
  0x9a   : > { %4049 = vmatprep.mubr.f32.mxu0 %v5338_v14  ;;  %4084 = vmatprep.subr.mxu1 %v3125_v43  ;;  %6468 = vst [vmem:[#allocation34_spill] sm:$0xff] %v5360_v3  ;;  %v5378_v14 = vld [vmem:[%s4834_s26 + $0x170] sm:$0xff] }
  0x9b   : > { %4050 = vmatmul.mubr.f32.gmra.mxu0 %v5345_v35  ;;  %4085 = vmatpush3.msra.mxu1 %v3125_v43  ;;  %v3172_v35 = vld [vmem:[%s6404_s1 + $0x208] sm:$0xff] }
  0x9c   : > { %4164 = vmatprep.subr.mxu0 %v3173_v54  ;;  %3972 = vmatprep.mubr.f32.mxu1 %v5352_v46  ;;  %v5374_v43 = vld [vmem:[%s4834_s26 + $0x168] sm:$0xff] }
  0x9d   : > { %4165 = vmatpush3.msra.mxu0 %v3173_v54  ;;  %3973 = vmatmul.mubr.f32.gmra.mxu1 %v5356_v22  ;;  %v3123_v54 = vld [vmem:[%s6404_s1 + $0x180] sm:$0xff] }
  0x9e   : > { %4052 = vmatprep.mubr.f32.mxu0 %v5360_v3  ;;  %4086 = vmatprep.subr.mxu1 %v3124_v30  ;;  %v3171_v3 = vld [vmem:[%s6404_s1 + $0x200] sm:$0xff] }
  0x9f   : > { %4053 = vmatmul.mubr.f32.gmra.mxu0 %v5367_v10  ;;  %4087 = vmatpush3.msra.mxu1 %v3124_v30  ;;  %v3234_v30 = vld [vmem:[%s6404_s1 + $0x2f8] sm:$0xff] }
  0xa0   : > { %4166 = vmatprep.subr.mxu0 %v3172_v35  ;;  %3975 = vmatprep.mubr.f32.mxu1 %v5374_v43 }
  0xa1   : > { %4167 = vmatpush3.msra.mxu0 %v3172_v35  ;;  %3976 = vmatmul.mubr.f32.gmra.mxu1 %v5378_v14  ;;  %v3282_v35 = vld [vmem:[%s6404_s1 + $0x378] sm:$0xff] }
  0xa2   : > { %4055 = vmatprep.mubr.f32.mxu0 %v5382_v7  ;;  %4088 = vmatprep.subr.mxu1 %v3123_v54 }
  0xa3   : > { %4056 = vmatmul.mubr.f32.gmra.mxu0 %v5389_v2  ;;  %4089 = vmatpush3.msra.mxu1 %v3123_v54  ;;  %v3233_v54 = vld [vmem:[%s6404_s1 + $0x2f0] sm:$0xff] }
  0xa4   : > { %4168 = vmatprep.subr.mxu0 %v3171_v3  ;;  %4090 = vmatprep.mubr.f32.mxu1 %v5068_v27  ;;  %v3281_v27 = vld [vmem:[%s6404_s1 + $0x370] sm:$0xff] }
  0xa5   : > { %4169 = vmatpush3.msra.mxu0 %v3171_v3  ;;  %4091 = vmatmul.mubr.f32.vlgmr.msra.gmra.mxu1 %v5071_v29  ;;  %v5546_v29 = vld [vmem:[%s4834_s26 + $0x180] sm:$0xff]  ;;  %v6470_v3 = vld [vmem:[#allocation6_spill] sm:$0xff] }
  0xa6   : > { %4170 = vmatprep.mubr.f32.mxu0 %v4865_v25  ;;  %4218 = vmatprep.subr.mxu1 %v3234_v30  ;;  %v3232_v25 = vld [vmem:[%s6404_s1 + $0x2e8] sm:$0xff] }
  0xa7   : > { %4171 = vmatmul.mubr.f32.vlgmr.msra.gmra.mxu0 %v4875_v28  ;;  %4219 = vmatpush3.msra.mxu1 %v3234_v30  ;;  %v3280_v28 = vld [vmem:[%s6404_s1 + $0x368] sm:$0xff] }
  0xa8   : > { %4298 = vmatprep.subr.mxu0 %v3282_v35  ;;  %4093 = vmatprep.mubr.f32.mxu1 %v5088_v38  ;;  %v5550_v30 = vld [vmem:[%s4834_s26 + $0x188] sm:$0xff] }
  0xa9   : > { %4299 = vmatpush3.msra.mxu0 %v3282_v35  ;;  %4094 = vmatmul.mubr.f32.gmra.mxu1 %v5092_v40  ;;  %v6471_v35 = vld [vmem:[#allocation7_spill] sm:$0xff] }
  0xaa   : > { %4173 = vmatprep.mubr.f32.mxu0 %v4893_v33  ;;  %4220 = vmatprep.subr.mxu1 %v3233_v54  ;;  %v3231_v33 = vld [vmem:[%s6404_s1 + $0x2e0] sm:$0xff] }
  0xab   : > { %4174 = vmatmul.mubr.f32.gmra.mxu0 %v4903_v36  ;;  %4221 = vmatpush3.msra.mxu1 %v3233_v54  ;;  %v3279_v36 = vld [vmem:[%s6404_s1 + $0x360] sm:$0xff] }
  0xac   : > { %4300 = vmatprep.subr.mxu0 %v3281_v27  ;;  %4096 = vmatprep.mubr.f32.mxu1 %v5110_v51  ;;  %v5554_v54 = vld [vmem:[%s4834_s26 + $0x181] sm:$0xff] }
  0xad   : > { %4301 = vmatpush3.msra.mxu0 %v3281_v27  ;;  %4097 = vmatmul.mubr.f32.gmra.mxu1 %v5114_v53  ;;  %v3219_v27 = vld [vmem:[%s6404_s1 + $0x280] sm:$0xff] }
  0xae   : > { %4176 = vmatprep.mubr.f32.mxu0 %v4921_v41  ;;  %4222 = vmatprep.subr.mxu1 %v3232_v25  ;;  %v3230_v41 = vld [vmem:[%s6404_s1 + $0x2d8] sm:$0xff] }
  0xaf   : > { %4177 = vmatmul.mubr.f32.gmra.mxu0 %v4931_v44  ;;  %4223 = vmatpush3.msra.mxu1 %v3232_v25  ;;  %v3278_v44 = vld [vmem:[%s6404_s1 + $0x358] sm:$0xff]  ;;  %v5561_v25 = vld [vmem:[%s4834_s26 + $0x189] sm:$0xff] }
  0xb0   : > { %4302 = vmatprep.subr.mxu0 %v3280_v28  ;;  %4099 = vmatprep.mubr.f32.mxu1 %v5132_v62 }
  0xb1   : > { %4303 = vmatpush3.msra.mxu0 %v3280_v28  ;;  %4100 = vmatmul.mubr.f32.gmra.mxu1 %v5136_v0  ;;  %v3267_v28 = vld [vmem:[%s6404_s1 + $0x300] sm:$0xff] }
  0xb2   : > { %4179 = vmatprep.mubr.f32.mxu0 %v4949_v49  ;;  %4224 = vmatprep.subr.mxu1 %v3231_v33  ;;  %v3229_v49 = vld [vmem:[%s6404_s1 + $0x2d0] sm:$0xff] }
  0xb3   : > { %4180 = vmatmul.mubr.f32.gmra.mxu0 %v4959_v52  ;;  %4225 = vmatpush3.msra.mxu1 %v3231_v33  ;;  %v3277_v52 = vld [vmem:[%s6404_s1 + $0x350] sm:$0xff]  ;;  %v3330_v33 = vld [vmem:[%s6404_s1 + $0x3f8] sm:$0xff] }
  0xb4   : > { %4304 = vmatprep.subr.mxu0 %v3279_v36  ;;  %4102 = vmatprep.mubr.f32.mxu1 %v5154_v11 }
  0xb5   : > { %4305 = vmatpush3.msra.mxu0 %v3279_v36  ;;  %4103 = vmatmul.mubr.f32.gmra.mxu1 %v5158_v13  ;;  %v6472_v36 = vld [vmem:[#allocation8_spill] sm:$0xff] }
  0xb6   : > { %4182 = vmatprep.mubr.f32.mxu0 %v4977_v57  ;;  %4226 = vmatprep.subr.mxu1 %v3230_v41  ;;  %v3228_v57 = vld [vmem:[%s6404_s1 + $0x2c8] sm:$0xff] }
  0xb7   : > { %4183 = vmatmul.mubr.f32.gmra.mxu0 %v4987_v60  ;;  %4227 = vmatpush3.msra.mxu1 %v3230_v41  ;;  %v3276_v60 = vld [vmem:[%s6404_s1 + $0x348] sm:$0xff]  ;;  %v6473_v41 = vld [vmem:[#allocation9_spill] sm:$0xff] }
  0xb8   : > { %4306 = vmatprep.subr.mxu0 %v3278_v44  ;;  %4105 = vmatprep.mubr.f32.mxu1 %v5176_v20 }
  0xb9   : > { %4307 = vmatpush3.msra.mxu0 %v3278_v44  ;;  %4106 = vmatmul.mubr.f32.gmra.mxu1 %v5180_v21  ;;  %v3378_v44 = vld [vmem:[%s6404_s1 + $0x478] sm:$0xff] }
  0xba   : > { %4185 = vmatprep.mubr.f32.mxu0 %v5005_v1  ;;  %4228 = vmatprep.subr.mxu1 %v3229_v49  ;;  %v3227_v1 = vld [vmem:[%s6404_s1 + $0x2c0] sm:$0xff] }
  0xbb   : > { %4186 = vmatmul.mubr.f32.gmra.mxu0 %v5015_v4  ;;  %4229 = vmatpush3.msra.mxu1 %v3229_v49  ;;  %v3275_v4 = vld [vmem:[%s6404_s1 + $0x340] sm:$0xff]  ;;  %v3329_v49 = vld [vmem:[%s6404_s1 + $0x3f0] sm:$0xff] }
  0xbc   : > { %4308 = vmatprep.subr.mxu0 %v3277_v52  ;;  %4108 = vmatprep.mubr.f32.mxu1 %v5198_v45 }
  0xbd   : > { %4309 = vmatpush3.msra.mxu0 %v3277_v52  ;;  %4109 = vmatmul.mubr.f32.gmra.mxu1 %v5202_v48  ;;  %v6474_v52 = vld [vmem:[#allocation10_spill] sm:$0xff] }
  0xbe   : > { %4188 = vmatprep.mubr.f32.mxu0 %v5033_v9  ;;  %4230 = vmatprep.subr.mxu1 %v3228_v57  ;;  %v3226_v9 = vld [vmem:[%s6404_s1 + $0x2b8] sm:$0xff] }
  0xbf   : > { %4189 = vmatmul.mubr.f32.gmra.mxu0 %v5043_v12  ;;  %4231 = vmatpush3.msra.mxu1 %v3228_v57  ;;  %v3274_v12 = vld [vmem:[%s6404_s1 + $0x338] sm:$0xff]  ;;  %v6475_v57 = vld [vmem:[#allocation11_spill] sm:$0xff] }
  0xc0   : > { %4310 = vmatprep.subr.mxu0 %v3276_v60  ;;  %4111 = vmatprep.mubr.f32.mxu1 %v5220_v15 }
  0xc1   : > { %4311 = vmatpush3.msra.mxu0 %v3276_v60  ;;  %4112 = vmatmul.mubr.f32.gmra.mxu1 %v5224_v19  ;;  %v3377_v60 = vld [vmem:[%s6404_s1 + $0x470] sm:$0xff] }
  0xc2   : > { %4191 = vmatprep.mubr.f32.mxu0 %v4840_v16  ;;  %4232 = vmatprep.subr.mxu1 %v3227_v1  ;;  %v3225_v16 = vld [vmem:[%s6404_s1 + $0x2b0] sm:$0xff] }
  0xc3   : > { %4192 = vmatmul.mubr.f32.gmra.mxu0 %v4844_v18  ;;  %4233 = vmatpush3.msra.mxu1 %v3227_v1  ;;  %v3273_v18 = vld [vmem:[%s6404_s1 + $0x330] sm:$0xff]  ;;  %v6477_v1 = vld [vmem:[#allocation13_spill] sm:$0xff] }
  0xc4   : > { %4312 = vmatprep.subr.mxu0 %v3275_v4  ;;  %4114 = vmatprep.mubr.f32.mxu1 %v5242_v5 }
  0xc5   : > { %4313 = vmatpush3.msra.mxu0 %v3275_v4  ;;  %4115 = vmatmul.mubr.f32.gmra.mxu1 %v5246_v56  ;;  %v3376_v4 = vld [vmem:[%s6404_s1 + $0x468] sm:$0xff] }
  0xc6   : > { %4194 = vmatprep.mubr.f32.mxu0 %v4859_v23  ;;  %4234 = vmatprep.subr.mxu1 %v3226_v9  ;;  %v3224_v23 = vld [vmem:[%s6404_s1 + $0x2a8] sm:$0xff] }
  0xc7   : > { %4195 = vmatmul.mubr.f32.gmra.mxu0 %v4868_v26  ;;  %4235 = vmatpush3.msra.mxu1 %v3226_v9  ;;  %v3272_v26 = vld [vmem:[%s6404_s1 + $0x328] sm:$0xff]  ;;  %v6479_v9 = vld [vmem:[#allocation15_spill] sm:$0xff] }
  0xc8   : > { %4314 = vmatprep.subr.mxu0 %v3274_v12  ;;  %4117 = vmatprep.mubr.f32.mxu1 %v5264_v32 }
  0xc9   : > { %4315 = vmatpush3.msra.mxu0 %v3274_v12  ;;  %4118 = vmatmul.mubr.f32.gmra.mxu1 %v5268_v24  ;;  %v3375_v12 = vld [vmem:[%s6404_s1 + $0x460] sm:$0xff] }
  0xca   : > { %4197 = vmatprep.mubr.f32.mxu0 %v4886_v31  ;;  %4236 = vmatprep.subr.mxu1 %v3225_v16  ;;  %v3223_v31 = vld [vmem:[%s6404_s1 + $0x2a0] sm:$0xff] }
  0xcb   : > { %4198 = vmatmul.mubr.f32.gmra.mxu0 %v4896_v34  ;;  %4237 = vmatpush3.msra.mxu1 %v3225_v16  ;;  %v3271_v34 = vld [vmem:[%s6404_s1 + $0x320] sm:$0xff] }
  0xcc   : > { %4316 = vmatprep.subr.mxu0 %v3273_v18  ;;  %4120 = vmatprep.mubr.f32.mxu1 %v5286_v17  ;;  %v6481_v16 = vld [vmem:[#allocation17_spill] sm:$0xff] }
  0xcd   : > { %4317 = vmatpush3.msra.mxu0 %v3273_v18  ;;  %4121 = vmatmul.mubr.f32.gmra.mxu1 %v5290_v8  ;;  %v3374_v18 = vld [vmem:[%s6404_s1 + $0x458] sm:$0xff] }
  0xce   : > { %4200 = vmatprep.mubr.f32.mxu0 %v4914_v39  ;;  %4238 = vmatprep.subr.mxu1 %v3224_v23  ;;  %v3222_v39 = vld [vmem:[%s6404_s1 + $0x298] sm:$0xff] }
  0xcf   : > { %4201 = vmatmul.mubr.f32.gmra.mxu0 %v4924_v42  ;;  %4239 = vmatpush3.msra.mxu1 %v3224_v23  ;;  %v3270_v42 = vld [vmem:[%s6404_s1 + $0x318] sm:$0xff] }
  0xd0   : > { %4318 = vmatprep.subr.mxu0 %v3272_v26  ;;  %4123 = vmatprep.mubr.f32.mxu1 %v5308_v6 }
  0xd1   : > { %4319 = vmatpush3.msra.mxu0 %v3272_v26  ;;  %4124 = vmatmul.mubr.f32.gmra.mxu1 %v5312_v61  ;;  %v6482_v26 = vld [vmem:[#allocation18_spill] sm:$0xff] }
  0xd2   : > { %4203 = vmatprep.mubr.f32.mxu0 %v4942_v47  ;;  %4240 = vmatprep.subr.mxu1 %v3223_v31  ;;  %v3221_v47 = vld [vmem:[%s6404_s1 + $0x290] sm:$0xff] }
  0xd3   : > { %4204 = vmatmul.mubr.f32.gmra.mxu0 %v4952_v50  ;;  %4241 = vmatpush3.msra.mxu1 %v3223_v31  ;;  %v3269_v50 = vld [vmem:[%s6404_s1 + $0x310] sm:$0xff] }
  0xd4   : > { %4320 = vmatprep.subr.mxu0 %v3271_v34  ;;  %4126 = vmatprep.mubr.f32.mxu1 %v5330_v59 }
  0xd5   : > { %4321 = vmatpush3.msra.mxu0 %v3271_v34  ;;  %4127 = vmatmul.mubr.f32.gmra.mxu1 %v5334_v37  ;;  %v6483_v34 = vld [vmem:[#allocation19_spill] sm:$0xff] }
  0xd6   : > { %4206 = vmatprep.mubr.f32.mxu0 %v4970_v55  ;;  %4242 = vmatprep.subr.mxu1 %v3222_v39  ;;  %v6469_v55 = vld [vmem:[#allocation5_spill] sm:$0xff] }
  0xd7   : > { %4207 = vmatmul.mubr.f32.gmra.mxu0 %v4980_v58  ;;  %4243 = vmatpush3.msra.mxu1 %v3222_v39  ;;  %v3220_v58 = vld [vmem:[%s6404_s1 + $0x288] sm:$0xff] }
  0xd8   : > { %4322 = vmatprep.subr.mxu0 %v3270_v42  ;;  %4129 = vmatprep.mubr.f32.mxu1 %v5352_v46  ;;  %v3324_v39 = vld [vmem:[%s6404_s1 + $0x3c8] sm:$0xff] }
  0xd9   : > { %4323 = vmatpush3.msra.mxu0 %v3270_v42  ;;  %4130 = vmatmul.mubr.f32.gmra.mxu1 %v5356_v22 }
  0xda   : > { %4209 = vmatprep.mubr.f32.mxu0 %v4998_v63  ;;  %4244 = vmatprep.subr.mxu1 %v3221_v47  ;;  %v3268_v63 = vld [vmem:[%s6404_s1 + $0x308] sm:$0xff] }
  0xdb   : > { %4210 = vmatmul.mubr.f32.gmra.mxu0 %v6469_v55  ;;  %4245 = vmatpush3.msra.mxu1 %v3221_v47  ;;  %v6484_v47 = vld [vmem:[#allocation20_spill] sm:$0xff] }
  0xdc   : > { %4324 = vmatprep.subr.mxu0 %v3269_v50  ;;  %4132 = vmatprep.mubr.f32.mxu1 %v5374_v43 }
  0xdd   : > { %4325 = vmatpush3.msra.mxu0 %v3269_v50  ;;  %4133 = vmatmul.mubr.f32.gmra.mxu1 %v5378_v14  ;;  %v6485_v50 = vld [vmem:[#allocation21_spill] sm:$0xff] }
  0xde   : > { %4212 = vmatprep.mubr.f32.mxu0 %v6470_v3  ;;  %4246 = vmatprep.subr.mxu1 %v3220_v58  ;;  %v6486_v3 = vld [vmem:[#allocation22_spill] sm:$0xff] }
  0xdf   : > { %4213 = vmatmul.mubr.f32.gmra.mxu0 %v6471_v35  ;;  %4247 = vmatpush3.msra.mxu1 %v3220_v58  ;;  %v3323_v58 = vld [vmem:[%s6404_s1 + $0x3c0] sm:$0xff]  ;;  %v6487_v35 = vld [vmem:[#allocation23_spill] sm:$0xff] }
  0xe0   : > { %4326 = vmatprep.subr.mxu0 %v3268_v63  ;;  %4135 = vmatprep.mubr.f32.mxu1 %v5546_v29 }
  0xe1   : > { %4327 = vmatpush3.msra.mxu0 %v3268_v63  ;;  %4136 = vmatmul.mubr.f32.gmra.mxu1 %v5550_v30 }
  0xe2   : > { %4215 = vmatprep.mubr.f32.mxu0 %v5554_v54  ;;  %4248 = vmatprep.subr.mxu1 %v3219_v27 }
  0xe3   : > { %4216 = vmatmul.mubr.f32.gmra.mxu0 %v5561_v25  ;;  %4249 = vmatpush3.msra.mxu1 %v3219_v27 }
  0xe4   : > { %4328 = vmatprep.subr.mxu0 %v3267_v28  ;;  %4250 = vmatprep.mubr.f32.mxu1 %v6472_v36  ;;  %v6488_v36 = vld [vmem:[#allocation24_spill] sm:$0xff] }
  0xe5   : > { %4329 = vmatpush3.msra.mxu0 %v3267_v28  ;;  %4251 = vmatmul.mubr.f32.vlgmr.msra.gmra.mxu1 %v6473_v41  ;;  %v6489_v41 = vld [vmem:[#allocation25_spill] sm:$0xff] }
  0xe6   : > { %4330 = vmatprep.mubr.f32.mxu0 %v5088_v38  ;;  %4378 = vmatprep.subr.mxu1 %v3330_v33  ;;  %v3328_v38 = vld [vmem:[%s6404_s1 + $0x3e8] sm:$0xff] }
  0xe7   : > { %4331 = vmatmul.mubr.f32.vlgmr.msra.gmra.mxu0 %v5092_v40  ;;  %4379 = vmatpush3.msra.mxu1 %v3330_v33  ;;  %v6476_v40 = vld [vmem:[#allocation12_spill] sm:$0xff] }
  0xe8   : > { %4458 = vmatprep.subr.mxu0 %v3378_v44  ;;  %4253 = vmatprep.mubr.f32.mxu1 %v6474_v52  ;;  %v6490_v52 = vld [vmem:[#allocation26_spill] sm:$0xff] }
  0xe9   : > { %4459 = vmatpush3.msra.mxu0 %v3378_v44  ;;  %4254 = vmatmul.mubr.f32.gmra.mxu1 %v6475_v57  ;;  %v3321_v44 = vld [vmem:[%s6404_s1 + $0x3b0] sm:$0xff] }
  0xea   : > { %4333 = vmatprep.mubr.f32.mxu0 %v5110_v51  ;;  %4380 = vmatprep.subr.mxu1 %v3329_v49  ;;  %v3327_v51 = vld [vmem:[%s6404_s1 + $0x3e0] sm:$0xff]  ;;  %v6491_v57 = vld [vmem:[#allocation27_spill] sm:$0xff] }
  0xeb   : > { %4334 = vmatmul.mubr.f32.gmra.mxu0 %v5114_v53  ;;  %4381 = vmatpush3.msra.mxu1 %v3329_v49  ;;  %v6478_v53 = vld [vmem:[#allocation14_spill] sm:$0xff] }
  0xec   : > { %4460 = vmatprep.subr.mxu0 %v3377_v60  ;;  %4256 = vmatprep.mubr.f32.mxu1 %v6476_v40 }
  0xed   : > { %4461 = vmatpush3.msra.mxu0 %v3377_v60  ;;  %4257 = vmatmul.mubr.f32.gmra.mxu1 %v6477_v1  ;;  %v6492_v1 = vld [vmem:[#allocation28_spill] sm:$0xff] }
  0xee   : > { %4336 = vmatprep.mubr.f32.mxu0 %v5132_v62  ;;  %4382 = vmatprep.subr.mxu1 %v3328_v38  ;;  %v3326_v62 = vld [vmem:[%s6404_s1 + $0x3d8] sm:$0xff] }
  0xef   : > { %4337 = vmatmul.mubr.f32.gmra.mxu0 %v5136_v0  ;;  %4383 = vmatpush3.msra.mxu1 %v3328_v38  ;;  %v6480_v0 = vld [vmem:[#allocation16_spill] sm:$0xff]  ;;  %v3320_v38 = vld [vmem:[%s6404_s1 + $0x3a8] sm:$0xff] }
  0xf0   : > { %4462 = vmatprep.subr.mxu0 %v3376_v4  ;;  %4259 = vmatprep.mubr.f32.mxu1 %v6478_v53 }
  0xf1   : > { %4463 = vmatpush3.msra.mxu0 %v3376_v4  ;;  %4260 = vmatmul.mubr.f32.gmra.mxu1 %v6479_v9  ;;  %v6493_v4 = vld [vmem:[#allocation29_spill] sm:$0xff] }
  0xf2   : > { %4339 = vmatprep.mubr.f32.mxu0 %v5154_v11  ;;  %4384 = vmatprep.subr.mxu1 %v3327_v51 }
  0xf3   : > { %4340 = vmatmul.mubr.f32.gmra.mxu0 %v5158_v13  ;;  %4385 = vmatpush3.msra.mxu1 %v3327_v51  ;;  %v3325_v13 = vld [vmem:[%s6404_s1 + $0x3d0] sm:$0xff] }
  0xf4   : > { %4464 = vmatprep.subr.mxu0 %v3375_v12  ;;  %4262 = vmatprep.mubr.f32.mxu1 %v6480_v0  ;;  %v3318_v0 = vld [vmem:[%s6404_s1 + $0x398] sm:$0xff] }
  0xf5   : > { %4465 = vmatpush3.msra.mxu0 %v3375_v12  ;;  %4263 = vmatmul.mubr.f32.gmra.mxu1 %v6481_v16  ;;  %v6494_v12 = vld [vmem:[#allocation30_spill] sm:$0xff] }
  0xf6   : > { %4342 = vmatprep.mubr.f32.mxu0 %v5176_v20  ;;  %4386 = vmatprep.subr.mxu1 %v3326_v62  ;;  %v5618_v11 = vpop.f32.mrf.mxu1  ;;  %v3373_v20 = vld [vmem:[%s6404_s1 + $0x450] sm:$0xff] }
  0xf7   : > { %4343 = vmatmul.mubr.f32.gmra.mxu0 %v5180_v21  ;;  %4387 = vmatpush3.msra.mxu1 %v3326_v62  ;;  %v5624_v23 = vpop.f32.mrf.mxu0  ;;  %v6495_v62 = vld [vmem:[#allocation31_spill] sm:$0xff] }
  0xf8   : > { %4466 = vmatprep.subr.mxu0 %v3374_v18  ;;  %4265 = vmatprep.mubr.f32.mxu1 %v6482_v26  ;;  %v5627_v31 = vpop.f32.mrf.mxu1 }
  0xf9   : > { %4467 = vmatpush3.msra.mxu0 %v3374_v18  ;;  %4266 = vmatmul.mubr.f32.gmra.mxu1 %v6483_v34  ;;  %v5633_v21 = vpop.f32.mrf.mxu0  ;;  %v6496_v18 = vld [vmem:[#allocation32_spill] sm:$0xff]  ;;  %v3317_v34 = vld [vmem:[%s6404_s1 + $0x390] sm:$0xff] }
  0xfa   : > { %4345 = vmatprep.mubr.f32.mxu0 %v5198_v45  ;;  %4388 = vmatprep.subr.mxu1 %v3325_v13  ;;  %v3372_v45 = vld [vmem:[%s6404_s1 + $0x448] sm:$0xff] }
  0xfb   : > { %4346 = vmatmul.mubr.f32.gmra.mxu0 %v5202_v48  ;;  %4389 = vmatpush3.msra.mxu1 %v3325_v13  ;;  %v5640_v42 = vpop.f32.mrf.mxu1  ;;  %v6497_v13 = vld [vmem:[#allocation33_spill] sm:$0xff] }
  0xfc   : > { %4468 = vmatprep.subr.mxu0 %v3373_v20  ;;  %4268 = vmatprep.mubr.f32.mxu1 %v6484_v47 }
  0xfd   : > { %4469 = vmatpush3.msra.mxu0 %v3373_v20  ;;  %4269 = vmatmul.mubr.f32.gmra.mxu1 %v6485_v50  ;;  %v5647_v55 = vpop.f32.mrf.mxu0  ;;  %v5649_v48 = vpop.f32.mrf.mxu1 }
  0xfe   : > { %4348 = vmatprep.mubr.f32.mxu0 %v5220_v15  ;;  %4390 = vmatprep.subr.mxu1 %v3324_v39  ;;  %v3371_v15 = vld [vmem:[%s6404_s1 + $0x440] sm:$0xff] }
  0xff   : > { %4349 = vmatmul.mubr.f32.gmra.mxu0 %v5224_v19  ;;  %4391 = vmatpush3.msra.mxu1 %v3324_v39  ;;  %v5656_v63 = vpop.f32.mrf.mxu0  ;;  %v3322_v19 = vld [vmem:[%s6404_s1 + $0x3b8] sm:$0xff]  ;;  %v6498_v39 = vld [vmem:[#allocation34_spill] sm:$0xff] }
 0x100   : > { %4470 = vmatprep.subr.mxu0 %v3372_v45  ;;  %4271 = vmatprep.mubr.f32.mxu1 %v6486_v3  ;;  %v3315_v3 = vld [vmem:[%s6404_s1 + $0x380] sm:$0xff] }
 0x101   : > { %4471 = vmatpush3.msra.mxu0 %v3372_v45  ;;  %4272 = vmatmul.mubr.f32.gmra.mxu1 %v6487_v35  ;;  %v5663_v27 = vpop.f32.mrf.mxu1  ;;  %v5774_v45 = vld [vmem:[%s4834_s26 + $0x182] sm:$0xff] }
 0x102   : > { %4351 = vmatprep.mubr.f32.mxu0 %v5242_v5  ;;  %4392 = vmatprep.subr.mxu1 %v3323_v58  ;;  %v3370_v5 = vld [vmem:[%s6404_s1 + $0x438] sm:$0xff] }
 0x103   : > { %4352 = vmatmul.mubr.f32.gmra.mxu0 %v5246_v56  ;;  %4393 = vmatpush3.msra.mxu1 %v3323_v58  ;;  %v5670_v28 = vpop.f32.mrf.mxu0  ;;  %v5672_v33 = vpop.f32.mrf.mxu1  ;;  %v5778_v58 = vld [vmem:[%s4834_s26 + $0x18a] sm:$0xff] }
 0x104   : > { %4472 = vmatprep.subr.mxu0 %v3371_v15  ;;  %4274 = vmatprep.mubr.f32.mxu1 %v6488_v36  ;;  %v3284_v36 = vld [vmem:[%s4834_s26 + $0x39] sm:$0xff] }
 0x105   : > { %4473 = vmatpush3.msra.mxu0 %v3371_v15  ;;  %4275 = vmatmul.mubr.f32.gmra.mxu1 %v6489_v41  ;;  %v5679_v56 = vpop.f32.mrf.mxu0  ;;  %v3363_v15 = vld [vmem:[%s6404_s1 + $0x400] sm:$0xff] }
 0x106   : > { %4354 = vmatprep.mubr.f32.mxu0 %v5264_v32  ;;  %4394 = vmatprep.subr.mxu1 %v3322_v19  ;;  %v3369_v32 = vld [vmem:[%s6404_s1 + $0x430] sm:$0xff] }
 0x107   : > { %4355 = vmatmul.mubr.f32.gmra.mxu0 %v5268_v24  ;;  %4395 = vmatpush3.msra.mxu1 %v3322_v19  ;;  %v5686_v49 = vpop.f32.mrf.mxu1  ;;  %v3283_v19 = vld [vmem:[%s4834_s26 + $0x31] sm:$0xff] }
 0x108   : > { %4474 = vmatprep.subr.mxu0 %v3370_v5  ;;  %4277 = vmatprep.mubr.f32.mxu1 %v6490_v52  ;;  %v3332_v52 = vld [vmem:[%s4834_s26 + $0x3a] sm:$0xff] }
 0x109   : > { %4475 = vmatpush3.msra.mxu0 %v3370_v5  ;;  %4278 = vmatmul.mubr.f32.gmra.mxu1 %v6491_v57  ;;  %v5693_v60 = vpop.f32.mrf.mxu0  ;;  %v5695_v24 = vpop.f32.mrf.mxu1  ;;  %v3331_v5 = vld [vmem:[%s4834_s26 + $0x32] sm:$0xff] }
 0x10a   : > { %4357 = vmatprep.mubr.f32.mxu0 %v5286_v17  ;;  %4396 = vmatprep.subr.mxu1 %v3321_v44  ;;  %v3368_v17 = vld [vmem:[%s6404_s1 + $0x428] sm:$0xff] }
 0x10b   : > { %4358 = vmatmul.mubr.f32.gmra.mxu0 %v5290_v8  ;;  %4397 = vmatpush3.msra.mxu1 %v3321_v44  ;;  %v5702_v40 = vpop.f32.mrf.mxu0  ;;  %v3319_v8 = vld [vmem:[%s6404_s1 + $0x3a0] sm:$0xff]  ;;  %v3285_v44 = vld [vmem:[%s4834_s26 + $0x49] sm:$0xff] }
 0x10c   : > { %4476 = vmatprep.subr.mxu0 %v3369_v32  ;;  %4280 = vmatprep.mubr.f32.mxu1 %v6492_v1  ;;  %v3286_v1 = vld [vmem:[%s4834_s26 + $0x51] sm:$0xff] }
 0x10d   : > { %4477 = vmatpush3.msra.mxu0 %v3369_v32  ;;  %4281 = vmatmul.mubr.f32.gmra.mxu1 %v6493_v4  ;;  %v5709_v51 = vpop.f32.mrf.mxu1  ;;  %v3333_v32 = vld [vmem:[%s4834_s26 + $0x4a] sm:$0xff] }
 0x10e   : > { %4360 = vmatprep.mubr.f32.mxu0 %v5308_v6  ;;  %4398 = vmatprep.subr.mxu1 %v3320_v38  ;;  %v3367_v6 = vld [vmem:[%s6404_s1 + $0x420] sm:$0xff] }
 0x10f   : > { %4361 = vmatmul.mubr.f32.gmra.mxu0 %v5312_v61  ;;  %4399 = vmatpush3.msra.mxu1 %v3320_v38  ;;  %v5716_v53 = vpop.f32.mrf.mxu0  ;;  %v5718_v9 = vpop.f32.mrf.mxu1 }
 0x110   : > { %4478 = vmatprep.subr.mxu0 %v3368_v17  ;;  %4283 = vmatprep.mubr.f32.mxu1 %v6494_v12 }
 0x111   : > { %4479 = vmatpush3.msra.mxu0 %v3368_v17  ;;  %4284 = vmatmul.mubr.f32.gmra.mxu1 %v6495_v62  ;;  %v5725_v61 = vpop.f32.mrf.mxu0 }
 0x112   : > { %4363 = vmatprep.mubr.f32.mxu0 %v5330_v59  ;;  %4400 = vmatprep.subr.mxu1 %v3319_v8  ;;  %v3366_v59 = vld [vmem:[%s6404_s1 + $0x418] sm:$0xff] }
 0x113   : > { %4364 = vmatmul.mubr.f32.gmra.mxu0 %v5334_v37  ;;  %4401 = vmatpush3.msra.mxu1 %v3319_v8  ;;  %v5732_v16 = vpop.f32.mrf.mxu1  ;;  %v3287_v8 = vld [vmem:[%s4834_s26 + $0x61] sm:$0xff] }
 0x114   : > { %4480 = vmatprep.subr.mxu0 %v3367_v6  ;;  %4286 = vmatprep.mubr.f32.mxu1 %v6496_v18 }
 0x115   : > { %4481 = vmatpush3.msra.mxu0 %v3367_v6  ;;  %4287 = vmatmul.mubr.f32.gmra.mxu1 %v6497_v13  ;;  %v5739_v26 = vpop.f32.mrf.mxu0  ;;  %v5741_v37 = vpop.f32.mrf.mxu1  ;;  %v3334_v6 = vld [vmem:[%s4834_s26 + $0x52] sm:$0xff] }
 0x116   : > { %4366 = vmatprep.mubr.f32.mxu0 %v5352_v46  ;;  %4402 = vmatprep.subr.mxu1 %v3318_v0  ;;  %v3365_v46 = vld [vmem:[%s6404_s1 + $0x410] sm:$0xff] }
 0x117   : > { %4367 = vmatmul.mubr.f32.gmra.mxu0 %v5356_v22  ;;  %4403 = vmatpush3.msra.mxu1 %v3318_v0  ;;  %v5748_v20 = vpop.f32.mrf.mxu0  ;;  %v3316_v22 = vld [vmem:[%s6404_s1 + $0x388] sm:$0xff] }
 0x118   : > { %4482 = vmatprep.subr.mxu0 %v3366_v59  ;;  %4289 = vmatprep.mubr.f32.mxu1 %v6498_v39 }
 0x119   : > { %4483 = vmatpush3.msra.mxu0 %v3366_v59  ;;  %4290 = vmatmul.mubr.f32.gmra.mxu1 %v5367_v10  ;;  %v5755_v47 = vpop.f32.mrf.mxu1 }
 0x11a   : > { %4369 = vmatprep.mubr.f32.mxu0 %v5374_v43  ;;  %4404 = vmatprep.subr.mxu1 %v3317_v34 }
 0x11b   : > { %4370 = vmatmul.mubr.f32.gmra.mxu0 %v5378_v14  ;;  %4405 = vmatpush3.msra.mxu1 %v3317_v34  ;;  %v5762_v10 = vpop.f32.mrf.mxu0  ;;  %v5764_v50 = vpop.f32.mrf.mxu1  ;;  %v3364_v14 = vld [vmem:[%s6404_s1 + $0x408] sm:$0xff] }
 0x11c   : > { %4484 = vmatprep.subr.mxu0 %v3365_v46  ;;  %4292 = vmatprep.mubr.f32.mxu1 %v5382_v7  ;;  %v3288_v34 = vld [vmem:[%s4834_s26 + $0x69] sm:$0xff] }
 0x11d   : > { %4485 = vmatpush3.msra.mxu0 %v3365_v46  ;;  %4293 = vmatmul.mubr.f32.gmra.mxu1 %v5389_v2  ;;  %v5771_v43 = vpop.f32.mrf.mxu0  ;;  %v3265_v2 = vld [vmem:[%s4834_s26 + $0x198] sm:$0xff] }
 0x11e   : > { %4372 = vmatprep.mubr.f32.mxu0 %v5546_v29  ;;  %4406 = vmatprep.subr.mxu1 %v3316_v22  ;;  %v3266_v29 = vld [vmem:[%s4834_s26 + $0x1a0] sm:$0xff] }
 0x11f   : > { %4373 = vmatmul.mubr.f32.gmra.mxu0 %v5550_v30  ;;  %4407 = vmatpush3.msra.mxu1 %v3316_v22  ;;  %v5781_v7 = vpop.f32.mrf.mxu1  ;;  %v3289_v22 = vld [vmem:[%s4834_s26 + $0x79] sm:$0xff] }
 0x120   : > { %4486 = vmatprep.subr.mxu0 %v3364_v14  ;;  %4295 = vmatprep.mubr.f32.mxu1 %v5774_v45 }
 0x121   : > { %4487 = vmatpush3.msra.mxu0 %v3364_v14  ;;  %4296 = vmatmul.mubr.f32.gmra.mxu1 %v5778_v58  ;;  %v5790_v30 = vpop.f32.mrf.mxu0  ;;  %v5792_v35 = vpop.f32.mrf.mxu1 }
 0x122   : > { %4375 = vmatprep.mubr.f32.mxu0 %v3265_v2  ;;  %4408 = vmatprep.subr.mxu1 %v3315_v3  ;;  %v3336_v2 = vld [vmem:[%s4834_s26 + $0x6a] sm:$0xff] }
 0x123   : > { %4376 = vmatmul.mubr.f32.gmra.mxu0 %v3266_v29  ;;  %4409 = vmatpush3.msra.mxu1 %v3315_v3  ;;  %v5799_v41 = vpop.f32.mrf.mxu0 }
 0x124   : > { %4488 = vmatprep.subr.mxu0 %v3363_v15  ;;  %4410 = vmatprep.mubr.f32.mxu1 %v3283_v19 }
 0x125   : > { %4489 = vmatpush3.msra.mxu0 %v3363_v15  ;;  %v3932_v57 = vpop.f32.mrf.mxu1  ;;  %4411 = vmatmul.mubr.f32.vlgmr.msra.gmra.mxu1 %v3284_v36  ;;  %v3337_v15 = vld [vmem:[%s4834_s26 + $0x7a] sm:$0xff] }
 0x126   : > { %v581_v38 = vadd.f32 %v3932_v57, %v5624_v23  ;;  %4490 = vmatprep.mubr.f32.mxu0 %v3331_v5  ;;  %4413 = vmatprep.mubr.f32.mxu1 %v3285_v44  ;;  %v3335_v23 = vld [vmem:[%s4834_s26 + $0x62] sm:$0xff] }
 0x127   : > { %v4012_v4 = vpop.f32.mrf.mxu0  ;;  %4491 = vmatmul.mubr.f32.vlgmr.msra.gmra.mxu0 %v3332_v52  ;;  %v575_v17 = vpop.f32.mrf.mxu1  ;;  %v3290_v36 = vld [vmem:[%s4834_s26 + $0x81] sm:$0xff]  ;;  %v3291_v52 = vld [vmem:[%s4834_s26 + $0x91] sm:$0xff] }
 0x128   : > { %v5808_v12 = vadd.f32 %v4012_v4, %v581_v38  ;;  %v576_v62 = vadd.f32 %v575_v17, %v5633_v21  ;;  %4493 = vmatprep.mubr.f32.mxu0 %v3333_v32  ;;  %v3338_v32 = vld [vmem:[%s4834_s26 + $0x82] sm:$0xff]  ;;  %v3339_v4 = vld [vmem:[%s4834_s26 + $0x92] sm:$0xff] }
 0x129   : > { %v849_v0 = vpop.f32.mrf.mxu0  ;;  %v3935_v18 = vpop.f32.mrf.mxu1  ;;  %4414 = vmatmul.mubr.f32.gmra.mxu1 %v3286_v1 }
 0x12a   : > { %v5813_v13 = vadd.f32 %v849_v0, %v576_v62  ;;  %v591_v59 = vadd.f32 %v3935_v18, %v5647_v55  ;;  %4416 = vmatprep.mubr.f32.mxu1 %v3287_v8  ;;  %v3292_v8 = vld [vmem:[%s4834_s26 + $0x99] sm:$0xff]  ;;  %v3293_v0 = vld [vmem:[%s4834_s26 + $0xa9] sm:$0xff] }
 0x12b   : > { %v4015_v39 = vpop.f32.mrf.mxu0  ;;  %4494 = vmatmul.mubr.f32.gmra.mxu0 %v3334_v6  ;;  %v585_v46 = vpop.f32.mrf.mxu1 }
 0x12c   : > { %v5818_v21 = vadd.f32 %v4015_v39, %v591_v59  ;;  %v586_v14 = vadd.f32 %v585_v46, %v5656_v63  ;;  %4496 = vmatprep.mubr.f32.mxu0 %v3335_v23  ;;  %v3340_v23 = vld [vmem:[%s4834_s26 + $0x9a] sm:$0xff]  ;;  %v3341_v39 = vld [vmem:[%s4834_s26 + $0xaa] sm:$0xff] }
 0x12d   : > { %v859_v3 = vpop.f32.mrf.mxu0  ;;  %v3938_v29 = vpop.f32.mrf.mxu1  ;;  %4417 = vmatmul.mubr.f32.gmra.mxu1 %v3288_v34 }
 0x12e   : > { %v5823_v55 = vadd.f32 %v859_v3, %v586_v14  ;;  %v601_v19 = vadd.f32 %v3938_v29, %v5670_v28  ;;  %4419 = vmatprep.mubr.f32.mxu1 %v3289_v22  ;;  %v3294_v22 = vld [vmem:[%s4834_s26 + $0xb1] sm:$0xff]  ;;  %v3295_v3 = vld [vmem:[%s4834_s26 + $0xc1] sm:$0xff] }
 0x12f   : > { %v4018_v5 = vpop.f32.mrf.mxu0  ;;  %4497 = vmatmul.mubr.f32.gmra.mxu0 %v3336_v2  ;;  %v595_v44 = vpop.f32.mrf.mxu1 }
 0x130   : > { %v5828_v63 = vadd.f32 %v4018_v5, %v601_v19  ;;  %v596_v57 = vadd.f32 %v595_v44, %v5679_v56  ;;  %4499 = vmatprep.mubr.f32.mxu0 %v3337_v15  ;;  %v3342_v15 = vld [vmem:[%s4834_s26 + $0xb2] sm:$0xff]  ;;  %v3343_v5 = vld [vmem:[%s4834_s26 + $0xc2] sm:$0xff] }
 0x131   : > { %v869_v38 = vpop.f32.mrf.mxu0  ;;  %v3941_v1 = vpop.f32.mrf.mxu1  ;;  %4420 = vmatmul.mubr.f32.gmra.mxu1 %v3290_v36 }
 0x132   : > { %v5833_v28 = vadd.f32 %v869_v38, %v596_v57  ;;  %v611_v17 = vadd.f32 %v3941_v1, %v5693_v60  ;;  %4422 = vmatprep.mubr.f32.mxu1 %v3291_v52  ;;  %v3296_v52 = vld [vmem:[%s4834_s26 + $0xc9] sm:$0xff]  ;;  %v3297_v38 = vld [vmem:[%s4834_s26 + $0xd9] sm:$0xff] }
 0x133   : > { %v4021_v62 = vpop.f32.mrf.mxu0  ;;  %4500 = vmatmul.mubr.f32.gmra.mxu0 %v3338_v32  ;;  %v605_v6 = vpop.f32.mrf.mxu1 }
 0x134   : > { %v5838_v56 = vadd.f32 %v4021_v62, %v611_v17  ;;  %v606_v18 = vadd.f32 %v605_v6, %v5702_v40  ;;  %4502 = vmatprep.mubr.f32.mxu0 %v3339_v4  ;;  %v3344_v4 = vld [vmem:[%s4834_s26 + $0xca] sm:$0xff]  ;;  %v3345_v62 = vld [vmem:[%s4834_s26 + $0xda] sm:$0xff] }
 0x135   : > { %v879_v59 = vpop.f32.mrf.mxu0  ;;  %v3944_v34 = vpop.f32.mrf.mxu1  ;;  %4423 = vmatmul.mubr.f32.gmra.mxu1 %v3292_v8 }
 0x136   : > { %v5843_v60 = vadd.f32 %v879_v59, %v606_v18  ;;  %v621_v46 = vadd.f32 %v3944_v34, %v5716_v53  ;;  %4425 = vmatprep.mubr.f32.mxu1 %v3293_v0  ;;  %v3298_v0 = vld [vmem:[%s4834_s26 + $0xe1] sm:$0xff]  ;;  %v3299_v59 = vld [vmem:[%s4834_s26 + $0xf1] sm:$0xff] }
 0x137   : > { %v4024_v14 = vpop.f32.mrf.mxu0  ;;  %4503 = vmatmul.mubr.f32.gmra.mxu0 %v3340_v23  ;;  %v615_v2 = vpop.f32.mrf.mxu1 }
 0x138   : > { %v5848_v40 = vadd.f32 %v4024_v14, %v621_v46  ;;  %v616_v29 = vadd.f32 %v615_v2, %v5725_v61  ;;  %4505 = vmatprep.mubr.f32.mxu0 %v3341_v39  ;;  %v3346_v39 = vld [vmem:[%s4834_s26 + $0xe2] sm:$0xff]  ;;  %v3347_v14 = vld [vmem:[%s4834_s26 + $0xf2] sm:$0xff] }
 0x139   : > { %v889_v19 = vpop.f32.mrf.mxu0  ;;  %v3947_v36 = vpop.f32.mrf.mxu1  ;;  %4426 = vmatmul.mubr.f32.gmra.mxu1 %v3294_v22 }
 0x13a   : > { %v5853_v53 = vadd.f32 %v889_v19, %v616_v29  ;;  %v631_v44 = vadd.f32 %v3947_v36, %v5739_v26  ;;  %4428 = vmatprep.mubr.f32.mxu1 %v3295_v3  ;;  %v3300_v3 = vld [vmem:[%s4834_s26 + $0xf9] sm:$0xff]  ;;  %v3301_v19 = vld [vmem:[%s4834_s26 + $0x109] sm:$0xff] }
 0x13b   : > { %v4027_v57 = vpop.f32.mrf.mxu0  ;;  %4506 = vmatmul.mubr.f32.gmra.mxu0 %v3342_v15  ;;  %v625_v32 = vpop.f32.mrf.mxu1 }
 0x13c   : > { %v5858_v61 = vadd.f32 %v4027_v57, %v631_v44  ;;  %v626_v1 = vadd.f32 %v625_v32, %v5748_v20  ;;  %4508 = vmatprep.mubr.f32.mxu0 %v3343_v5  ;;  %v3348_v5 = vld [vmem:[%s4834_s26 + $0xfa] sm:$0xff]  ;;  %v3349_v57 = vld [vmem:[%s4834_s26 + $0x10a] sm:$0xff] }
 0x13d   : > { %v899_v17 = vpop.f32.mrf.mxu0  ;;  %v3950_v8 = vpop.f32.mrf.mxu1  ;;  %4429 = vmatmul.mubr.f32.gmra.mxu1 %v3296_v52 }
 0x13e   : > { %v5863_v26 = vadd.f32 %v899_v17, %v626_v1  ;;  %v641_v6 = vadd.f32 %v3950_v8, %v5762_v10  ;;  %4431 = vmatprep.mubr.f32.mxu1 %v3297_v38  ;;  %v3302_v38 = vld [vmem:[%s4834_s26 + $0x111] sm:$0xff]  ;;  %v3303_v17 = vld [vmem:[%s4834_s26 + $0x121] sm:$0xff] }
 0x13f   : > { %v4030_v18 = vpop.f32.mrf.mxu0  ;;  %4509 = vmatmul.mubr.f32.gmra.mxu0 %v3344_v4  ;;  %v635_v23 = vpop.f32.mrf.mxu1 }
 0x140   : > { %v5868_v20 = vadd.f32 %v4030_v18, %v641_v6  ;;  %v636_v34 = vadd.f32 %v635_v23, %v5771_v43  ;;  %4511 = vmatprep.mubr.f32.mxu0 %v3345_v62  ;;  %v3350_v62 = vld [vmem:[%s4834_s26 + $0x112] sm:$0xff]  ;;  %v3351_v18 = vld [vmem:[%s4834_s26 + $0x122] sm:$0xff] }
 0x141   : > { %v909_v46 = vpop.f32.mrf.mxu0  ;;  %v3953_v22 = vpop.f32.mrf.mxu1  ;;  %4432 = vmatmul.mubr.f32.gmra.mxu1 %v3298_v0 }
 0x142   : > { %v5873_v10 = vadd.f32 %v909_v46, %v636_v34  ;;  %v651_v2 = vadd.f32 %v3953_v22, %v5790_v30  ;;  %4434 = vmatprep.mubr.f32.mxu1 %v3299_v59  ;;  %v3304_v59 = vld [vmem:[%s4834_s26 + $0x129] sm:$0xff]  ;;  %v3305_v46 = vld [vmem:[%s4834_s26 + $0x139] sm:$0xff] }
 0x143   : > { %v4033_v29 = vpop.f32.mrf.mxu0  ;;  %4512 = vmatmul.mubr.f32.gmra.mxu0 %v3346_v39  ;;  %v645_v15 = vpop.f32.mrf.mxu1 }
 0x144   : > { %v5878_v43 = vadd.f32 %v4033_v29, %v651_v2  ;;  %v646_v36 = vadd.f32 %v645_v15, %v5799_v41  ;;  %4514 = vmatprep.mubr.f32.mxu0 %v3347_v14  ;;  %v3352_v14 = vld [vmem:[%s4834_s26 + $0x12a] sm:$0xff]  ;;  %v3353_v29 = vld [vmem:[%s4834_s26 + $0x13a] sm:$0xff] }
 0x145   : > { %v919_v44 = vpop.f32.mrf.mxu0  ;;  %v3956_v52 = vpop.f32.mrf.mxu1  ;;  %4435 = vmatmul.mubr.f32.gmra.mxu1 %v3300_v3 }
 0x146   : > { %v5883_v30 = vadd.f32 %v919_v44, %v646_v36  ;;  %v661_v32 = vadd.f32 %v3956_v52, %v5618_v11  ;;  %4437 = vmatprep.mubr.f32.mxu1 %v3301_v19  ;;  %v3306_v19 = vld [vmem:[%s4834_s26 + $0x141] sm:$0xff]  ;;  %v3307_v44 = vld [vmem:[%s4834_s26 + $0x151] sm:$0xff] }
 0x147   : > { %v4036_v1 = vpop.f32.mrf.mxu0  ;;  %4515 = vmatmul.mubr.f32.gmra.mxu0 %v3348_v5  ;;  %v655_v4 = vpop.f32.mrf.mxu1 }
 0x148   : > { %v5888_v41 = vadd.f32 %v4036_v1, %v661_v32  ;;  %v656_v8 = vadd.f32 %v655_v4, %v5627_v31  ;;  %4517 = vmatprep.mubr.f32.mxu0 %v3349_v57  ;;  %v3354_v57 = vld [vmem:[%s4834_s26 + $0x142] sm:$0xff]  ;;  %v3355_v1 = vld [vmem:[%s4834_s26 + $0x152] sm:$0xff] }
 0x149   : > { %v929_v6 = vpop.f32.mrf.mxu0  ;;  %v3959_v0 = vpop.f32.mrf.mxu1  ;;  %4438 = vmatmul.mubr.f32.gmra.mxu1 %v3302_v38 }
 0x14a   : > { %v5893_v11 = vadd.f32 %v929_v6, %v656_v8  ;;  %v671_v23 = vadd.f32 %v3959_v0, %v5640_v42  ;;  %4440 = vmatprep.mubr.f32.mxu1 %v3303_v17  ;;  %v3308_v17 = vld [vmem:[%s4834_s26 + $0x159] sm:$0xff]  ;;  %v3309_v6 = vld [vmem:[%s4834_s26 + $0x169] sm:$0xff] }
 0x14b   : > { %v4039_v34 = vpop.f32.mrf.mxu0  ;;  %4518 = vmatmul.mubr.f32.gmra.mxu0 %v3350_v62  ;;  %v665_v39 = vpop.f32.mrf.mxu1 }
 0x14c   : > { %v5898_v31 = vadd.f32 %v4039_v34, %v671_v23  ;;  %v666_v22 = vadd.f32 %v665_v39, %v5649_v48  ;;  %4520 = vmatprep.mubr.f32.mxu0 %v3351_v18  ;;  %v3356_v18 = vld [vmem:[%s4834_s26 + $0x15a] sm:$0xff]  ;;  %v3357_v34 = vld [vmem:[%s4834_s26 + $0x16a] sm:$0xff] }
 0x14d   : > { %v939_v2 = vpop.f32.mrf.mxu0  ;;  %v3962_v3 = vpop.f32.mrf.mxu1  ;;  %4441 = vmatmul.mubr.f32.gmra.mxu1 %v3304_v59 }
 0x14e   : > { %v5903_v42 = vadd.f32 %v939_v2, %v666_v22  ;;  %v681_v15 = vadd.f32 %v3962_v3, %v5663_v27  ;;  %4443 = vmatprep.mubr.f32.mxu1 %v3305_v46  ;;  %v3310_v46 = vld [vmem:[%s4834_s26 + $0x171] sm:$0xff] }
 0x14f   : > { %v4042_v36 = vpop.f32.mrf.mxu0  ;;  %4521 = vmatmul.mubr.f32.gmra.mxu0 %v3352_v14  ;;  %v675_v5 = vpop.f32.mrf.mxu1  ;;  %v3358_v3 = vld [vmem:[%s4834_s26 + $0x172] sm:$0xff] }
 0x150   : > { %v5908_v48 = vadd.f32 %v4042_v36, %v681_v15  ;;  %v676_v52 = vadd.f32 %v675_v5, %v5672_v33  ;;  %4523 = vmatprep.mubr.f32.mxu0 %v3353_v29 }
 0x151   : > { %v949_v32 = vpop.f32.mrf.mxu0  ;;  %v3965_v38 = vpop.f32.mrf.mxu1  ;;  %4444 = vmatmul.mubr.f32.gmra.mxu1 %v3306_v19 }
 0x152   : > { %v5913_v27 = vadd.f32 %v949_v32, %v676_v52  ;;  %v691_v4 = vadd.f32 %v3965_v38, %v5686_v49  ;;  %4446 = vmatprep.mubr.f32.mxu1 %v3307_v44  ;;  %v3313_v44 = vld [vmem:[%s4834_s26 + $0x199] sm:$0xff] }
 0x153   : > { %v4045_v8 = vpop.f32.mrf.mxu0  ;;  %4524 = vmatmul.mubr.f32.gmra.mxu0 %v3354_v57  ;;  %v685_v62 = vpop.f32.mrf.mxu1  ;;  %v3361_v38 = vld [vmem:[%s4834_s26 + $0x19a] sm:$0xff] }
 0x154   : > { %v5918_v33 = vadd.f32 %v4045_v8, %v691_v4  ;;  %v686_v0 = vadd.f32 %v685_v62, %v5695_v24  ;;  %4526 = vmatprep.mubr.f32.mxu0 %v3355_v1  ;;  %v3314_v1 = vld [vmem:[%s4834_s26 + $0x1a1] sm:$0xff] }
 0x155   : > { %v959_v23 = vpop.f32.mrf.mxu0  ;;  %v3968_v59 = vpop.f32.mrf.mxu1  ;;  %4447 = vmatmul.mubr.f32.gmra.mxu1 %v3308_v17 }
 0x156   : > { %v5923_v39 = vadd.f32 %v959_v23, %v686_v0  ;;  %v701_v49 = vadd.f32 %v3968_v59, %v5709_v51  ;;  %4449 = vmatprep.mubr.f32.mxu1 %v3309_v6 }
 0x157   : > { %v4048_v22 = vpop.f32.mrf.mxu0  ;;  %4527 = vmatmul.mubr.f32.gmra.mxu0 %v3356_v18  ;;  %v695_v14 = vpop.f32.mrf.mxu1 }
 0x158   : > { %v5927_v2 = vadd.f32 %v4048_v22, %v701_v49  ;;  %v696_v24 = vadd.f32 %v695_v14, %v5718_v9  ;;  %4529 = vmatprep.mubr.f32.mxu0 %v3357_v34 }
 0x159   : > { %v969_v29 = vpop.f32.mrf.mxu0  ;;  %v3971_v15 = vpop.f32.mrf.mxu1  ;;  %4450 = vmatmul.mubr.f32.gmra.mxu1 %v3310_v46 }
 0x15a   : > { %v5931_v19 = vadd.f32 %v969_v29, %v696_v24  ;;  %v711_v51 = vadd.f32 %v3971_v15, %v5732_v16  ;;  %4452 = vmatprep.mubr.f32.mxu1 %v5554_v54 }
 0x15b   : > { %v4051_v36 = vpop.f32.mrf.mxu0  ;;  %4530 = vmatmul.mubr.f32.gmra.mxu0 %v3358_v3  ;;  %v705_v5 = vpop.f32.mrf.mxu1 }
 0x15c   : > { %v5936_v52 = vadd.f32 %v4051_v36, %v711_v51  ;;  %v706_v9 = vadd.f32 %v705_v5, %v5741_v37  ;;  %4532 = vmatprep.mubr.f32.mxu0 %v5774_v45  ;;  %v3362_v45 = vld [vmem:[%s4834_s26 + $0x1a2] sm:$0xff]  ;;  %s175_s26 = sand.u32 1, %s4688_s13  }
 0x15d   : > { %v979_v57 = vpop.f32.mrf.mxu0  ;;  %v3974_v32 = vpop.f32.mrf.mxu1  ;;  %4453 = vmatmul.mubr.f32.gmra.mxu1 %v5561_v25  ;;  %s3057_s29 = sshll.u32 %s175_s26, 8  ;;  %s6358_s15 = scalar_lea.sflag [#allocation3], %s175_s26 }
 0x15e   : > { %v5942_v16 = vadd.f32 %v979_v57, %v706_v9  ;;  %v721_v54 = vadd.f32 %v3974_v32, %v5755_v47  ;;  %4455 = vmatprep.mubr.f32.mxu1 %v3313_v44  ;;  %s6205_s5 = scalar_lea.vmem [#allocation2], %s3057_s29 }
 0x15f   : > { %v4054_v4 = vpop.f32.mrf.mxu0  ;;  %4533 = vmatmul.mubr.f32.gmra.mxu0 %v5778_v58  ;;  %v715_v17 = vpop.f32.mrf.mxu1  ;;  %s2969_s7 = sshll.u32 %s6205_s5, 4  ;;  %s6351_s7 = int_to_ptr.vmem [resolvable:$true] %s2969_s7 }
 0x160   : > { %v5947_v8 = vadd.f32 %v4054_v4, %v721_v54  ;;  %v716_v37 = vadd.f32 %v715_v17, %v5764_v50  ;;  %4535 = vmatprep.mubr.f32.mxu0 %v3361_v38  ;;  %s4628_s11 = scalar_lea.vmem %s6351_s7, 4096  ;;  %p4635_p1 = scmp.lt.s32.totalorder %s6351_s7, %s4633_s19 }
 0x161   : > { %v989_v62 = vpop.f32.mrf.mxu0  ;;  %v3977_v6 = vpop.f32.mrf.mxu1  ;;  %4456 = vmatmul.mubr.f32.gmra.mxu1 %v3314_v1  ;;  %p4629_p12 = scmp.ne.s32.totalorder %s6351_s7, %s4628_s11  ;;  %p4636_p2 = scmp.lt.s32.totalorder %s4634_s21, %s4628_s11 }
 0x162   : > { %v5951_v25 = vadd.f32 %v989_v62, %v716_v37  ;;  %v731_v0 = vadd.f32 %v3977_v6, %v5781_v7 }
 0x163   : > { %v4057_v47 = vpop.f32.mrf.mxu0  ;;  %4536 = vmatmul.mubr.f32.gmra.mxu0 %v3362_v45  ;;  %v725_v18 = vpop.f32.mrf.mxu1  ;;  %p4630_p13 = pnand %p4629_p12, %p4769_p4  ;;  %p4637_p3 = por %p4636_p2, %p4635_p1 }
 0x164   : > { %v5954_v23 = vadd.f32 %v4057_v47, %v731_v0  ;;  %v726_v58 = vadd.f32 %v725_v18, %v5792_v35 }
 0x165   : > { %v999_v59 = vpop.f32.mrf.mxu0  ;;  %v4092_v34 = vpop.f32.mrf.mxu1  ;;  %p4631_p0 = pneg %p4630_p13 }
 0x166   : > { %v5957_v49 = vadd.f32 %v999_v59, %v726_v58  ;;  %v1318_v50 = vadd.f32 %v4092_v34, %v5808_v12 }
 0x167   : > { %v4172_v46 = vpop.f32.mrf.mxu0  ;;  %v1158_v22 = vpop.f32.mrf.mxu1  ;;  %p4638_p5 = pnand %p4637_p3, %p4631_p0 }
 0x168   : > { %v5960_v14 = vadd.f32 %v4172_v46, %v1318_v50  ;;  %v1317_v24 = vadd.f32 %v1158_v22, %v5813_v13 }
 0x169   : > { %v1464_v7 = vpop.f32.mrf.mxu0  ;;  %v4095_v3 = vpop.f32.mrf.mxu1 }
 0x16a   : > { %v5963_v29 = vadd.f32 %v1464_v7, %v1317_v24  ;;  %v1320_v15 = vadd.f32 %v4095_v3, %v5818_v21 }
 0x16b   : > { %v4175_v51 = vpop.f32.mrf.mxu0  ;;  %v1168_v35 = vpop.f32.mrf.mxu1 }
 0x16c   : > { %v5966_v36 = vadd.f32 %v4175_v51, %v1320_v15  ;;  %v1319_v5 = vadd.f32 %v1168_v35, %v5823_v55 }
 0x16d   : > { %v1474_v44 = vpop.f32.mrf.mxu0  ;;  %v4098_v12 = vpop.f32.mrf.mxu1 }
 0x16e   : > { %v5969_v9 = vadd.f32 %v1474_v44, %v1319_v5  ;;  %v1322_v57 = vadd.f32 %v4098_v12, %v5828_v63 }
 0x16f   : > { %v4178_v32 = vpop.f32.mrf.mxu0  ;;  %v1178_v13 = vpop.f32.mrf.mxu1 }
 0x170   : > { %v5972_v38 = vadd.f32 %v4178_v32, %v1322_v57  ;;  %v1321_v54 = vadd.f32 %v1178_v13, %v5833_v28 }
 0x171   : > { %v1484_v1 = vpop.f32.mrf.mxu0  ;;  %v4101_v21 = vpop.f32.mrf.mxu1 }
 0x172   : > { %v5975_v4 = vadd.f32 %v1484_v1, %v1321_v54  ;;  %v1324_v17 = vadd.f32 %v4101_v21, %v5838_v56 }
 0x173   : > { %v4181_v37 = vpop.f32.mrf.mxu0  ;;  %v1188_v55 = vpop.f32.mrf.mxu1 }
 0x174   : > { %v5978_v45 = vadd.f32 %v4181_v37, %v1324_v17  ;;  %v1323_v62 = vadd.f32 %v1188_v55, %v5843_v60 }
 0x175   : > { %v1494_v6 = vpop.f32.mrf.mxu0  ;;  %v4104_v63 = vpop.f32.mrf.mxu1 }
 0x176   : > { %v5981_v0 = vadd.f32 %v1494_v6, %v1323_v62  ;;  %v1326_v47 = vadd.f32 %v4104_v63, %v5848_v40 }
 0x177   : > { %v4184_v18 = vpop.f32.mrf.mxu0  ;;  %v1198_v28 = vpop.f32.mrf.mxu1 }
 0x178   : > { %v5984_v58 = vadd.f32 %v4184_v18, %v1326_v47  ;;  %v1325_v59 = vadd.f32 %v1198_v28, %v5853_v53 }
 0x179   : > { %v1504_v34 = vpop.f32.mrf.mxu0  ;;  %v4107_v56 = vpop.f32.mrf.mxu1 }
 0x17a   : > { %v5987_v50 = vadd.f32 %v1504_v34, %v1325_v59  ;;  %v1328_v46 = vadd.f32 %v4107_v56, %v5858_v61 }
 0x17b   : > { %v4187_v22 = vpop.f32.mrf.mxu0  ;;  %v1208_v60 = vpop.f32.mrf.mxu1 }
 0x17c   : > { %v5990_v24 = vadd.f32 %v4187_v22, %v1328_v46  ;;  %v1327_v7 = vadd.f32 %v1208_v60, %v5863_v26 }
 0x17d   : > { %v1514_v3 = vpop.f32.mrf.mxu0  ;;  %v4110_v40 = vpop.f32.mrf.mxu1 }
 0x17e   : > { %v5993_v15 = vadd.f32 %v1514_v3, %v1327_v7  ;;  %v1330_v51 = vadd.f32 %v4110_v40, %v5868_v20 }
 0x17f   : > { %v4190_v35 = vpop.f32.mrf.mxu0  ;;  %v1218_v53 = vpop.f32.mrf.mxu1 }
 0x180   : > { %v5996_v5 = vadd.f32 %v4190_v35, %v1330_v51  ;;  %v1329_v44 = vadd.f32 %v1218_v53, %v5873_v10 }
 0x181   : > { %v1524_v12 = vpop.f32.mrf.mxu0  ;;  %v4113_v61 = vpop.f32.mrf.mxu1 }
 0x182   : > { %v5999_v57 = vadd.f32 %v1524_v12, %v1329_v44  ;;  %v1332_v32 = vadd.f32 %v4113_v61, %v5878_v43 }
 0x183   : > { %v4193_v13 = vpop.f32.mrf.mxu0  ;;  %v1228_v26 = vpop.f32.mrf.mxu1 }
 0x184   : > { %v6002_v54 = vadd.f32 %v4193_v13, %v1332_v32  ;;  %v1331_v1 = vadd.f32 %v1228_v26, %v5883_v30 }
 0x185   : > { %v1534_v21 = vpop.f32.mrf.mxu0  ;;  %v4116_v20 = vpop.f32.mrf.mxu1 }
 0x186   : > { %v6005_v17 = vadd.f32 %v1534_v21, %v1331_v1  ;;  %v1334_v37 = vadd.f32 %v4116_v20, %v5888_v41 }
 0x187   : > { %v4196_v55 = vpop.f32.mrf.mxu0  ;;  %v1238_v10 = vpop.f32.mrf.mxu1 }
 0x188   : > { %v6008_v62 = vadd.f32 %v4196_v55, %v1334_v37  ;;  %v1333_v6 = vadd.f32 %v1238_v10, %v5893_v11 }
 0x189   : > { %v1544_v63 = vpop.f32.mrf.mxu0  ;;  %v4119_v43 = vpop.f32.mrf.mxu1 }
 0x18a   : > { %v6011_v47 = vadd.f32 %v1544_v63, %v1333_v6  ;;  %v1336_v18 = vadd.f32 %v4119_v43, %v5898_v31 }
 0x18b   : > { %v4199_v28 = vpop.f32.mrf.mxu0  ;;  %v1248_v30 = vpop.f32.mrf.mxu1 }
 0x18c   : > { %v6014_v59 = vadd.f32 %v4199_v28, %v1336_v18  ;;  %v1335_v34 = vadd.f32 %v1248_v30, %v5903_v42 }
 0x18d   : > { %v1554_v56 = vpop.f32.mrf.mxu0  ;;  %v4122_v41 = vpop.f32.mrf.mxu1 }
 0x18e   : > { %6499 = vst [vmem:[#allocation5_spill] sm:$0xff] %v6014_v59  ;;  %v6017_v46 = vadd.f32 %v1554_v56, %v1335_v34  ;;  %v1338_v22 = vadd.f32 %v4122_v41, %v5908_v48 }
 0x18f   : > { %v4202_v60 = vpop.f32.mrf.mxu0  ;;  %v1258_v11 = vpop.f32.mrf.mxu1 }
 0x190   : > { %6500 = vst [vmem:[#allocation6_spill] sm:$0xff] %v6017_v46  ;;  %v6020_v7 = vadd.f32 %v4202_v60, %v1338_v22  ;;  %v1337_v3 = vadd.f32 %v1258_v11, %v5913_v27 }
 0x191   : > { %v1564_v40 = vpop.f32.mrf.mxu0  ;;  %v4125_v31 = vpop.f32.mrf.mxu1 }
 0x192   : > { %6501 = vst [vmem:[#allocation7_spill] sm:$0xff] %v6020_v7  ;;  %v6023_v51 = vadd.f32 %v1564_v40, %v1337_v3  ;;  %v1340_v35 = vadd.f32 %v4125_v31, %v5918_v33 }
 0x193   : > { %v4205_v53 = vpop.f32.mrf.mxu0  ;;  %v1268_v42 = vpop.f32.mrf.mxu1 }
 0x194   : > { %6502 = vst [vmem:[#allocation8_spill] sm:$0xff] %v6023_v51  ;;  %v6026_v44 = vadd.f32 %v4205_v53, %v1340_v35  ;;  %v1339_v12 = vadd.f32 %v1268_v42, %v5923_v39 }
 0x195   : > { %v1574_v61 = vpop.f32.mrf.mxu0  ;;  %v4128_v48 = vpop.f32.mrf.mxu1 }
 0x196   : > { %6503 = vst [vmem:[#allocation9_spill] sm:$0xff] %v6026_v44  ;;  %v6029_v32 = vadd.f32 %v1574_v61, %v1339_v12  ;;  %v1342_v13 = vadd.f32 %v4128_v48, %v5927_v2 }
 0x197   : > { %v4208_v26 = vpop.f32.mrf.mxu0  ;;  %v1278_v27 = vpop.f32.mrf.mxu1 }
 0x198   : > { %6504 = vst [vmem:[#allocation10_spill] sm:$0xff] %v6029_v32  ;;  %v6032_v1 = vadd.f32 %v4208_v26, %v1342_v13  ;;  %v1341_v21 = vadd.f32 %v1278_v27, %v5931_v19 }
 0x199   : > { %v1584_v20 = vpop.f32.mrf.mxu0  ;;  %v4131_v33 = vpop.f32.mrf.mxu1 }
 0x19a   : > { %6505 = vst [vmem:[#allocation11_spill] sm:$0xff] %v6032_v1  ;;  %v6035_v37 = vadd.f32 %v1584_v20, %v1341_v21  ;;  %v1344_v55 = vadd.f32 %v4131_v33, %v5936_v52 }
 0x19b   : > { %v4211_v10 = vpop.f32.mrf.mxu0  ;;  %v1288_v39 = vpop.f32.mrf.mxu1 }
 0x19c   : > { %6506 = vst [vmem:[#allocation12_spill] sm:$0xff] %v6035_v37  ;;  %v6038_v6 = vadd.f32 %v4211_v10, %v1344_v55  ;;  %v1343_v63 = vadd.f32 %v1288_v39, %v5942_v16 }
 0x19d   : > { %v1594_v43 = vpop.f32.mrf.mxu0  ;;  %v4134_v2 = vpop.f32.mrf.mxu1 }
 0x19e   : > { %6507 = vst [vmem:[#allocation13_spill] sm:$0xff] %v6038_v6  ;;  %v6041_v18 = vadd.f32 %v1594_v43, %v1343_v63  ;;  %v1346_v28 = vadd.f32 %v4134_v2, %v5947_v8 }
 0x19f   : > { %v4214_v30 = vpop.f32.mrf.mxu0  ;;  %v1298_v19 = vpop.f32.mrf.mxu1 }
 0x1a0   : > { %6508 = vst [vmem:[#allocation14_spill] sm:$0xff] %v6041_v18  ;;  %v6044_v34 = vadd.f32 %v4214_v30, %v1346_v28  ;;  %v1345_v56 = vadd.f32 %v1298_v19, %v5951_v25 }
 0x1a1   : > { %v1604_v41 = vpop.f32.mrf.mxu0  ;;  %v4137_v52 = vpop.f32.mrf.mxu1 }
 0x1a2   : > { %6509 = vst [vmem:[#allocation15_spill] sm:$0xff] %v6044_v34  ;;  %v6047_v22 = vadd.f32 %v1604_v41, %v1345_v56  ;;  %v1348_v60 = vadd.f32 %v4137_v52, %v5954_v23 }
 0x1a3   : > { %v4217_v11 = vpop.f32.mrf.mxu0  ;;  %v1308_v16 = vpop.f32.mrf.mxu1 }
 0x1a4   : > { %6510 = vst [vmem:[#allocation16_spill] sm:$0xff] %v6047_v22  ;;  %v6050_v3 = vadd.f32 %v4217_v11, %v1348_v60  ;;  %v1347_v40 = vadd.f32 %v1308_v16, %v5957_v49 }
 0x1a5   : > { %v1614_v31 = vpop.f32.mrf.mxu0  ;;  %v4252_v8 = vpop.f32.mrf.mxu1 }
 0x1a6   : > { %6511 = vst [vmem:[#allocation17_spill] sm:$0xff] %v6050_v3  ;;  %v6053_v35 = vadd.f32 %v1614_v31, %v1347_v40 }
 0x1a7   : > { %v6055_v53 = vpop.f32.mrf.mxu0  ;;  %v1770_v42 = vpop.f32.mrf.mxu1 }
 0x1a8   : > { %6512 = vst [vmem:[#allocation18_spill] sm:$0xff] %v6053_v35 }
 0x1a9   : > { %v6057_v25 = vpop.f32.mrf.mxu0  ;;  %v6059_v12 = vpop.f32.mrf.mxu1 }
 0x1ab   : > { %v6061_v61 = vpop.f32.mrf.mxu0  ;;  %v6063_v23 = vpop.f32.mrf.mxu1 }
 0x1ad   : > { %v6065_v48 = vpop.f32.mrf.mxu0  ;;  %v6067_v13 = vpop.f32.mrf.mxu1 }
 0x1af   : > { %v6069_v49 = vpop.f32.mrf.mxu0  ;;  %v6071_v26 = vpop.f32.mrf.mxu1 }
 0x1b1   : > { %v6073_v27 = vpop.f32.mrf.mxu0  ;;  %v6075_v21 = vpop.f32.mrf.mxu1 }
 0x1b3   : > { %v6077_v20 = vpop.f32.mrf.mxu0  ;;  %v6079_v33 = vpop.f32.mrf.mxu1 }
 0x1b5   : > { %v6081_v55 = vpop.f32.mrf.mxu0  ;;  %v6083_v10 = vpop.f32.mrf.mxu1 }
 0x1b7   : > { %v6085_v39 = vpop.f32.mrf.mxu0  ;;  %v6087_v63 = vpop.f32.mrf.mxu1 }
 0x1b9   : > { %v6089_v43 = vpop.f32.mrf.mxu0  ;;  %v6091_v2 = vpop.f32.mrf.mxu1 }
 0x1bb   : > { %v6093_v28 = vpop.f32.mrf.mxu0  ;;  %v6095_v30 = vpop.f32.mrf.mxu1 }
 0x1bd   : > { %v6097_v19 = vpop.f32.mrf.mxu0  ;;  %v6099_v56 = vpop.f32.mrf.mxu1 }
 0x1bf   : > { %v6101_v41 = vpop.f32.mrf.mxu0  ;;  %v6103_v52 = vpop.f32.mrf.mxu1 }
 0x1c1   : > { %v6105_v60 = vpop.f32.mrf.mxu0  ;;  %v6107_v11 = vpop.f32.mrf.mxu1 }
 0x1c3   : > { %v6109_v16 = vpop.f32.mrf.mxu0  ;;  %v6111_v40 = vpop.f32.mrf.mxu1 }
 0x1c5   : > { %v6113_v31 = vpop.f32.mrf.mxu0  ;;  %v6115_v35 = vpop.f32.mrf.mxu1 }
 0x1c7   : > { %v6117_v3 = vpop.f32.mrf.mxu0  ;;  %v6119_v22 = vpop.f32.mrf.mxu1 }
 0x1c9   : > { %v6121_v34 = vpop.f32.mrf.mxu0  ;;  %v6123_v18 = vpop.f32.mrf.mxu1 }
 0x1ca   : > { %6513 = vst [vmem:[#allocation19_spill] sm:$0xff] %v6121_v34  ;;  %6514 = vst [vmem:[#allocation20_spill] sm:$0xff] %v6123_v18 }
 0x1cb   : > { %v6125_v6 = vpop.f32.mrf.mxu0  ;;  %v6127_v37 = vpop.f32.mrf.mxu1 }
 0x1cc   : > { %6515 = vst [vmem:[#allocation21_spill] sm:$0xff] %v6125_v6  ;;  %6516 = vst [vmem:[#allocation22_spill] sm:$0xff] %v6127_v37 }
 0x1cd   : > { %v6129_v1 = vpop.f32.mrf.mxu0  ;;  %v6131_v32 = vpop.f32.mrf.mxu1 }
 0x1ce   : > { %6517 = vst [vmem:[#allocation23_spill] sm:$0xff] %v6129_v1 }
 0x1cf   : > { %v6133_v44 = vpop.f32.mrf.mxu0  ;;  %v6135_v51 = vpop.f32.mrf.mxu1 }
 0x1d0   : > { %6518 = vst [vmem:[#allocation24_spill] sm:$0xff] %v6133_v44  ;;  %6519 = vst [vmem:[#allocation25_spill] sm:$0xff] %v6135_v51 }
 0x1d1   : > { %v6137_v7 = vpop.f32.mrf.mxu0  ;;  %v6139_v46 = vpop.f32.mrf.mxu1 }
 0x1d2   : > { %6520 = vst [vmem:[#allocation26_spill] sm:$0xff] %v6137_v7  ;;  %6521 = vst [vmem:[#allocation27_spill] sm:$0xff] %v6139_v46 }
 0x1d3   : > { %v6141_v59 = vpop.f32.mrf.mxu0  ;;  %v6143_v34 = vpop.f32.mrf.mxu1 }
 0x1d4   : > { %6522 = vst [vmem:[#allocation28_spill] sm:$0xff] %v6141_v59  ;;  %6523 = vst [vmem:[#allocation29_spill] sm:$0xff] %v6143_v34 }
 0x1d5   : > { %v6145_v18 = vpop.f32.mrf.mxu0  ;;  %v6147_v6 = vpop.f32.mrf.mxu1 }
 0x1d6   : > { %6524 = vst [vmem:[#allocation30_spill] sm:$0xff] %v6145_v18  ;;  %6525 = vst [vmem:[#allocation31_spill] sm:$0xff] %v6147_v6 }
 0x1d7   : > { %v6149_v37 = vpop.f32.mrf.mxu0  ;;  %v6151_v1 = vpop.f32.mrf.mxu1 }
 0x1d8   : > { %6526 = vst [vmem:[#allocation32_spill] sm:$0xff] %v6149_v37  ;;  %6527 = vst [vmem:[#allocation33_spill] sm:$0xff] %v6151_v1  ;;  %v1930_v37 = vadd.f32 %v4252_v8, %v5960_v14  ;;  %v1931_v8 = vadd.f32 %v6063_v23, %v5969_v9  ;;  %v1933_v9 = vadd.f32 %v6071_v26, %v5975_v4 }
 0x1d9   : > { %v6153_v44 = vpop.f32.mrf.mxu0  ;;  %v6155_v51 = vpop.f32.mrf.mxu1 }
 0x1da   : > { %6528 = vst [vmem:[#allocation34_spill] sm:$0xff] %v6153_v44  ;;  %6529 = vst [vmem:[#allocation35_spill] sm:$0xff] %v6155_v51  ;;  %v1929_v51 = vadd.f32 %v1770_v42, %v5963_v29  ;;  %v1934_v29 = vadd.f32 %v6067_v13, %v5972_v38 }
 0x1db   : > { %v6157_v7 = vpop.f32.mrf.mxu0  ;;  %v6159_v46 = vpop.f32.mrf.mxu1 }
 0x1dc   : > { %6530 = vst [vmem:[#allocation36_spill] sm:$0xff] %v6157_v7  ;;  %6531 = vst [vmem:[#allocation37_spill] sm:$0xff] %v6159_v46  ;;  %v2238_v14 = vadd.f32 %v6057_v25, %v1929_v51  ;;  %v2240_v25 = vadd.f32 %v6065_v48, %v1931_v8  ;;  %v2242_v48 = vadd.f32 %v6073_v27, %v1933_v9 }
 0x1dd   : > { %v6161_v59 = vpop.f32.mrf.mxu0  ;;  %v6163_v34 = vpop.f32.mrf.mxu1 }
 0x1de   : > { %6532 = vst [vmem:[#allocation38_spill] sm:$0xff] %v6161_v59  ;;  %6533 = vst [vmem:[#allocation39_spill] sm:$0xff] %v6163_v34  ;;  %v2239_v59 = vadd.f32 %v6055_v53, %v1930_v37  ;;  %v6195_v37 = vld [vmem:[%s6405_s2] ss:$0 sm:$0xff] }
 0x1df   : > { %v6165_v18 = vpop.f32.mrf.mxu0  ;;  %v6167_v6 = vpop.f32.mrf.mxu1 }
 0x1e0   : > { %6534 = vst [vmem:[#allocation40_spill] sm:$0xff] %v6165_v18  ;;  %6535 = vst [vmem:[#allocation41_spill] sm:$0xff] %v6167_v6  ;;  %v1932_v18 = vadd.f32 %v6059_v12, %v5966_v36 }
 0x1e1   : > { %v6170_v1 = vpop.f32.mrf.mxu0  ;;  %v6172_v44 = vpop.f32.mrf.mxu1 }
 0x1e2   : > { %6536 = vst [vmem:[#allocation42_spill] sm:$0xff] %v6170_v1  ;;  %v2241_v53 = vadd.f32 %v6061_v61, %v1932_v18  ;;  %v1936_v18 = vadd.f32 %v6075_v21, %v5978_v45 }
 0x1e3   : > { %v6175_v7 = vpop.f32.mrf.mxu0  ;;  %v6177_v46 = vpop.f32.mrf.mxu1 }
 0x1e4   : > { %6537 = vst [vmem:[#allocation43_spill] sm:$0xff] %v6175_v7  ;;  %6538 = vst [vmem:[#allocation44_spill] sm:$0xff] %v6177_v46 }
 0x1e5   : > { %v6183_v34 = vpop.f32.mrf.mxu0  ;;  %v4412_v6 = vpop.f32.mrf.mxu1 }
 0x1e6   : > { %6539 = vst [vmem:[#allocation45_spill] sm:$0xff] %v6183_v34  ;;  %v2545_v1 = vadd.f32 %v4412_v6, %v2239_v59  ;;  %v2243_v34 = vadd.f32 %v6069_v49, %v1934_v29  ;;  %v1935_v49 = vadd.f32 %v6079_v33, %v5981_v0  ;;  %v1938_v29 = vadd.f32 %v6083_v10, %v5984_v58 }
 0x1e7   : > { %v4492_v42 = vpop.f32.mrf.mxu0  ;;  %v2385_v36 = vpop.f32.mrf.mxu1  ;;  %v1937_v0 = vadd.f32 %v6087_v63, %v5987_v50 }
 0x1e8   : > { %v2851_v12 = vadd.f32 %v4492_v42, %v2545_v1  ;;  %v2544_v51 = vadd.f32 %v2385_v36, %v2238_v14 }
 0x1e9   : > { %v2691_v59 = vpop.f32.mrf.mxu0  ;;  %v4415_v6 = vpop.f32.mrf.mxu1 }
 0x1ea   : > { %v2890_v38 = vadd.f32 %v6195_v37, %v2851_v12  ;;  %v2850_v23 = vadd.f32 %v2691_v59, %v2544_v51  ;;  %v2547_v13 = vadd.f32 %v4415_v6, %v2241_v53  ;;  %v1940_v6 = vadd.f32 %v6091_v2, %v5990_v24 }
 0x1eb   : > { %v4495_v7 = vpop.f32.mrf.mxu0  ;;  %v2395_v46 = vpop.f32.mrf.mxu1  ;;  %v1942_v24 = vadd.f32 %v6099_v56, %v5996_v5 }
 0x1ec   : > { %2922 = vst [vmem:[%s6205_s5 + $0x8] sm:$0xff] %v2890_v38  ;;  %v2889_v4 = vadd.f32 %v6195_v37, %v2850_v23  ;;  %v2853_v1 = vadd.f32 %v4495_v7, %v2547_v13  ;;  %v2546_v61 = vadd.f32 %v2395_v46, %v2240_v25  ;;  %v2245_v46 = vadd.f32 %v6077_v20, %v1936_v18 }
 0x1ed   : > { %v2701_v26 = vpop.f32.mrf.mxu0  ;;  %v4418_v14 = vpop.f32.mrf.mxu1  ;;  %v2247_v20 = vadd.f32 %v6085_v39, %v1938_v29  ;;  %v1939_v13 = vadd.f32 %v6095_v30, %v5993_v15  ;;  %v1941_v15 = vadd.f32 %v6103_v52, %v5999_v57  ;;  %v1944_v29 = vadd.f32 %v6107_v11, %v6002_v54 }
 0x1ee   : > { %2921 = vst [vmem:[%s6205_s5] sm:$0xff] %v2889_v4  ;;  %v2892_v45 = vadd.f32 %v6195_v37, %v2853_v1  ;;  %v2852_v21 = vadd.f32 %v2701_v26, %v2546_v61  ;;  %v2549_v8 = vadd.f32 %v4418_v14, %v2243_v34  ;;  %v2244_v34 = vadd.f32 %v6081_v55, %v1935_v49 }
 0x1ef   : > { %v4498_v42 = vpop.f32.mrf.mxu0  ;;  %v2405_v36 = vpop.f32.mrf.mxu1  ;;  %v2246_v55 = vadd.f32 %v6089_v43, %v1937_v0  ;;  %v2249_v61 = vadd.f32 %v6093_v28, %v1940_v6  ;;  %v2248_v49 = vadd.f32 %v6097_v19, %v1939_v13  ;;  %v2251_v28 = vadd.f32 %v6101_v41, %v1942_v24  ;;  %v6541_v6 = vld [vmem:[#allocation20_spill] sm:$0xff]  ;;  %v6544_v13 = vld [vmem:[#allocation22_spill] sm:$0xff]  ;;  %v6545_v24 = vld [vmem:[#allocation7_spill] sm:$0xff] }
 0x1f0   : > { %2924 = vst [vmem:[%s6205_s5 + $0x18] sm:$0xff] %v2892_v45  ;;  %v2891_v7 = vadd.f32 %v6195_v37, %v2852_v21  ;;  %v2855_v27 = vadd.f32 %v4498_v42, %v2549_v8  ;;  %v2548_v53 = vadd.f32 %v2405_v36, %v2242_v48  ;;  %v2250_v19 = vadd.f32 %v6105_v60, %v1941_v15 }
 0x1f1   : > { %v2711_v33 = vpop.f32.mrf.mxu0  ;;  %v4421_v12 = vpop.f32.mrf.mxu1  ;;  %v1946_v54 = vadd.f32 %v6115_v35, %v6008_v62 }
 0x1f2   : > { %2923 = vst [vmem:[%s6205_s5 + $0x10] sm:$0xff] %v2891_v7  ;;  %v2894_v58 = vadd.f32 %v6195_v37, %v2855_v27  ;;  %v2854_v10 = vadd.f32 %v2711_v33, %v2548_v53  ;;  %v2551_v51 = vadd.f32 %v4421_v12, %v2245_v46  ;;  %v1943_v7 = vadd.f32 %v6111_v40, %v6005_v17 }
 0x1f3   : > { %v4501_v9 = vpop.f32.mrf.mxu0  ;;  %v2415_v59 = vpop.f32.mrf.mxu1  ;;  %v2253_v33 = vadd.f32 %v6109_v16, %v1944_v29  ;;  %v1945_v17 = vadd.f32 %v6119_v22, %v6011_v47  ;;  %v2255_v16 = vadd.f32 %v6117_v3, %v1946_v54  ;;  %v6553_v54 = vld [vmem:[#allocation26_spill] sm:$0xff] }
 0x1f4   : > { %2926 = vst [vmem:[%s6205_s5 + $0x28] sm:$0xff] %v2894_v58  ;;  %v2893_v50 = vadd.f32 %v6195_v37, %v2854_v10  ;;  %v2857_v63 = vadd.f32 %v4501_v9, %v2551_v51  ;;  %v2550_v25 = vadd.f32 %v2415_v59, %v2244_v34  ;;  %v2252_v10 = vadd.f32 %v6113_v31, %v1943_v7  ;;  %v6540_v59 = vld [vmem:[#allocation5_spill] sm:$0xff]  ;;  %v6542_v31 = vld [vmem:[#allocation19_spill] sm:$0xff] }
 0x1f5   : > { %v2721_v38 = vpop.f32.mrf.mxu0  ;;  %v4424_v23 = vpop.f32.mrf.mxu1 }
 0x1f6   : > { %2925 = vst [vmem:[%s6205_s5 + $0x20] sm:$0xff] %v2893_v50  ;;  %v2896_v39 = vadd.f32 %v6195_v37, %v2857_v63  ;;  %v2856_v18 = vadd.f32 %v2721_v38, %v2550_v25  ;;  %v2553_v4 = vadd.f32 %v4424_v23, %v2247_v20  ;;  %v1948_v50 = vadd.f32 %v6541_v6, %v6540_v59  ;;  %v6543_v23 = vld [vmem:[#allocation6_spill] sm:$0xff] }
 0x1f7   : > { %v4504_v2 = vpop.f32.mrf.mxu0  ;;  %v2425_v1 = vpop.f32.mrf.mxu1  ;;  %v2254_v25 = vadd.f32 %v6542_v31, %v1945_v17 }
 0x1f8   : > { %2928 = vst [vmem:[%s6205_s5 + $0x38] sm:$0xff] %v2896_v39  ;;  %v2895_v43 = vadd.f32 %v6195_v37, %v2856_v18  ;;  %v2859_v48 = vadd.f32 %v4504_v2, %v2553_v4  ;;  %v2552_v26 = vadd.f32 %v2425_v1, %v2246_v55  ;;  %v1947_v39 = vadd.f32 %v6544_v13, %v6543_v23 }
 0x1f9   : > { %v2731_v30 = vpop.f32.mrf.mxu0  ;;  %v4427_v14 = vpop.f32.mrf.mxu1  ;;  %v1950_v2 = vadd.f32 %v6131_v32, %v6545_v24 }
 0x1fa   : > { %2927 = vst [vmem:[%s6205_s5 + $0x30] sm:$0xff] %v2895_v43  ;;  %v2898_v5 = vadd.f32 %v6195_v37, %v2859_v48  ;;  %v2858_v56 = vadd.f32 %v2731_v30, %v2552_v26  ;;  %v2555_v45 = vadd.f32 %v4427_v14, %v2249_v61  ;;  %v6546_v43 = vld [vmem:[#allocation21_spill] sm:$0xff]  ;;  %v6547_v14 = vld [vmem:[#allocation8_spill] sm:$0xff] }
 0x1fb   : > { %v4507_v21 = vpop.f32.mrf.mxu0  ;;  %v2435_v8 = vpop.f32.mrf.mxu1  ;;  %v2257_v48 = vadd.f32 %v6546_v43, %v1948_v50 }
 0x1fc   : > { %2930 = vst [vmem:[%s6205_s5 + $0x48] sm:$0xff] %v2898_v5  ;;  %v2897_v57 = vadd.f32 %v6195_v37, %v2858_v56  ;;  %v2861_v52 = vadd.f32 %v4507_v21, %v2555_v45  ;;  %v2554_v42 = vadd.f32 %v2435_v8, %v2248_v49  ;;  %v6548_v49 = vld [vmem:[#allocation25_spill] sm:$0xff] }
 0x1fd   : > { %v2741_v36 = vpop.f32.mrf.mxu0  ;;  %v4430_v46 = vpop.f32.mrf.mxu1  ;;  %v1949_v5 = vadd.f32 %v6548_v49, %v6547_v14 }
 0x1fe   : > { %2929 = vst [vmem:[%s6205_s5 + $0x40] sm:$0xff] %v2897_v57  ;;  %v2900_v41 = vadd.f32 %v6195_v37, %v2861_v52  ;;  %v2860_v27 = vadd.f32 %v2741_v36, %v2554_v42  ;;  %v2557_v53 = vadd.f32 %v4430_v46, %v2251_v28  ;;  %v6549_v28 = vld [vmem:[#allocation23_spill] sm:$0xff]  ;;  %v6550_v57 = vld [vmem:[#allocation24_spill] sm:$0xff]  ;;  %v6551_v36 = vld [vmem:[#allocation9_spill] sm:$0xff] }
 0x1ff   : > { %v4510_v11 = vpop.f32.mrf.mxu0  ;;  %v2445_v0 = vpop.f32.mrf.mxu1  ;;  %v2256_v21 = vadd.f32 %v6549_v28, %v1947_v39  ;;  %v2259_v52 = vadd.f32 %v6550_v57, %v1950_v2  ;;  %v6552_v46 = vld [vmem:[#allocation27_spill] sm:$0xff]  ;;  %v6563_v2 = vld [vmem:[#allocation13_spill] sm:$0xff] }
 0x200   : > { %2932 = vst [vmem:[%s6205_s5 + $0x58] sm:$0xff] %v2900_v41  ;;  %v2899_v60 = vadd.f32 %v6195_v37, %v2860_v27  ;;  %v2863_v12 = vadd.f32 %v4510_v11, %v2557_v53  ;;  %v2556_v34 = vadd.f32 %v2445_v0, %v2250_v19  ;;  %v1952_v7 = vadd.f32 %v6552_v46, %v6551_v36 }
 0x201   : > { %v2751_v40 = vpop.f32.mrf.mxu0  ;;  %v4433_v58 = vpop.f32.mrf.mxu1  ;;  %v2258_v11 = vadd.f32 %v6553_v54, %v1949_v5  ;;  %v6566_v5 = vld [vmem:[#allocation14_spill] sm:$0xff] }
 0x202   : > { %2931 = vst [vmem:[%s6205_s5 + $0x50] sm:$0xff] %v2899_v60  ;;  %v2902_v62 = vadd.f32 %v6195_v37, %v2863_v12  ;;  %v2862_v35 = vadd.f32 %v2751_v40, %v2556_v34  ;;  %v2559_v51 = vadd.f32 %v4433_v58, %v2253_v33  ;;  %v6554_v60 = vld [vmem:[#allocation10_spill] sm:$0xff]  ;;  %v6555_v12 = vld [vmem:[#allocation29_spill] sm:$0xff] }
 0x203   : > { %v4513_v20 = vpop.f32.mrf.mxu0  ;;  %v2455_v9 = vpop.f32.mrf.mxu1  ;;  %v1951_v34 = vadd.f32 %v6555_v12, %v6554_v60 }
 0x204   : > { %2934 = vst [vmem:[%s6205_s5 + $0x68] sm:$0xff] %v2902_v62  ;;  %v2901_v47 = vadd.f32 %v6195_v37, %v2862_v35  ;;  %v2865_v22 = vadd.f32 %v4513_v20, %v2559_v51  ;;  %v2558_v63 = vadd.f32 %v2455_v9, %v2252_v10  ;;  %v6556_v10 = vld [vmem:[#allocation11_spill] sm:$0xff]  ;;  %v6558_v20 = vld [vmem:[#allocation28_spill] sm:$0xff] }
 0x205   : > { %v2761_v55 = vpop.f32.mrf.mxu0  ;;  %v4436_v38 = vpop.f32.mrf.mxu1  ;;  %v6557_v62 = vld [vmem:[#allocation31_spill] sm:$0xff]  ;;  %v2261_v9 = vadd.f32 %v6558_v20, %v1952_v7 }
 0x206   : > { %2933 = vst [vmem:[%s6205_s5 + $0x60] sm:$0xff] %v2901_v47  ;;  %v2904_v3 = vadd.f32 %v6195_v37, %v2865_v22  ;;  %v2864_v18 = vadd.f32 %v2761_v55, %v2558_v63  ;;  %v2561_v4 = vadd.f32 %v4436_v38, %v2255_v16  ;;  %v1954_v35 = vadd.f32 %v6557_v62, %v6556_v10  ;;  %v6559_v47 = vld [vmem:[#allocation12_spill] sm:$0xff]  ;;  %v6560_v22 = vld [vmem:[#allocation33_spill] sm:$0xff]  ;;  %v6561_v55 = vld [vmem:[#allocation30_spill] sm:$0xff] }
 0x207   : > { %v4516_v1 = vpop.f32.mrf.mxu0  ;;  %v2465_v61 = vpop.f32.mrf.mxu1  ;;  %v1953_v63 = vadd.f32 %v6560_v22, %v6559_v47  ;;  %v2260_v38 = vadd.f32 %v6561_v55, %v1951_v34  ;;  %v6577_v22 = vld [vmem:[#allocation18_spill] sm:$0xff] }
 0x208   : > { %2936 = vst [vmem:[%s6205_s5 + $0x78] sm:$0xff] %v2904_v3  ;;  %v2903_v26 = vadd.f32 %v6195_v37, %v2864_v18  ;;  %v2867_v15 = vadd.f32 %v4516_v1, %v2561_v4  ;;  %v2560_v30 = vadd.f32 %v2465_v61, %v2254_v25  ;;  %v6562_v3 = vld [vmem:[#allocation32_spill] sm:$0xff]  ;;  %v6564_v1 = vld [vmem:[#allocation35_spill] sm:$0xff] }
 0x209   : > { %v2771_v56 = vpop.f32.mrf.mxu0  ;;  %v4439_v45 = vpop.f32.mrf.mxu1  ;;  %v2263_v18 = vadd.f32 %v6562_v3, %v1954_v35  ;;  %v1956_v61 = vadd.f32 %v6564_v1, %v6563_v2  ;;  %v6575_v35 = vld [vmem:[#allocation17_spill] sm:$0xff] }
 0x20a   : > { %2935 = vst [vmem:[%s6205_s5 + $0x70] sm:$0xff] %v2903_v26  ;;  %v2906_v32 = vadd.f32 %v6195_v37, %v2867_v15  ;;  %v2866_v8 = vadd.f32 %v2771_v56, %v2560_v30  ;;  %v2563_v29 = vadd.f32 %v4439_v45, %v2257_v48  ;;  %v6565_v15 = vld [vmem:[#allocation34_spill] sm:$0xff]  ;;  %v6567_v56 = vld [vmem:[#allocation37_spill] sm:$0xff] }
 0x20b   : > { %v4519_v42 = vpop.f32.mrf.mxu0  ;;  %v2475_v19 = vpop.f32.mrf.mxu1  ;;  %v2262_v30 = vadd.f32 %v6565_v15, %v1953_v63  ;;  %v1955_v45 = vadd.f32 %v6567_v56, %v6566_v5  ;;  %v6578_v63 = vld [vmem:[#allocation44_spill] sm:$0xff]  ;;  %v6580_v1 = vld [vmem:[#allocation45_spill] sm:$0xff] }
 0x20c   : > { %2938 = vst [vmem:[%s6205_s5 + $0x88] sm:$0xff] %v2906_v32  ;;  %v2905_v41 = vadd.f32 %v6195_v37, %v2866_v8  ;;  %v2869_v27 = vadd.f32 %v4519_v42, %v2563_v29  ;;  %v2562_v53 = vadd.f32 %v2475_v19, %v2256_v21  ;;  %v6568_v8 = vld [vmem:[#allocation15_spill] sm:$0xff]  ;;  %v6570_v19 = vld [vmem:[#allocation36_spill] sm:$0xff] }
 0x20d   : > { %v2781_v0 = vpop.f32.mrf.mxu0  ;;  %v4442_v33 = vpop.f32.mrf.mxu1  ;;  %v6569_v29 = vld [vmem:[#allocation39_spill] sm:$0xff]  ;;  %v2265_v36 = vadd.f32 %v6570_v19, %v1956_v61 }
 0x20e   : > { %2937 = vst [vmem:[%s6205_s5 + $0x80] sm:$0xff] %v2905_v41  ;;  %v2908_v17 = vadd.f32 %v6195_v37, %v2869_v27  ;;  %v2868_v40 = vadd.f32 %v2781_v0, %v2562_v53  ;;  %v2565_v58 = vadd.f32 %v4442_v33, %v2259_v52  ;;  %v1958_v57 = vadd.f32 %v6569_v29, %v6568_v8  ;;  %v6571_v27 = vld [vmem:[#allocation16_spill] sm:$0xff]  ;;  %v6572_v53 = vld [vmem:[#allocation41_spill] sm:$0xff]  ;;  %v6573_v33 = vld [vmem:[#allocation38_spill] sm:$0xff] }
 0x20f   : > { %v4522_v51 = vpop.f32.mrf.mxu0  ;;  %v2485_v16 = vpop.f32.mrf.mxu1  ;;  %v1957_v54 = vadd.f32 %v6572_v53, %v6571_v27  ;;  %v2264_v60 = vadd.f32 %v6573_v33, %v1955_v45 }
 0x210   : > { %2940 = vst [vmem:[%s6205_s5 + $0x98] sm:$0xff] %v2908_v17  ;;  %v2907_v59 = vadd.f32 %v6195_v37, %v2868_v40  ;;  %v2871_v6 = vadd.f32 %v4522_v51, %v2565_v58  ;;  %v2564_v50 = vadd.f32 %v2485_v16, %v2258_v11  ;;  %v6574_v40 = vld [vmem:[#allocation40_spill] sm:$0xff]  ;;  %v1960_v51 = vadd.f32 %v6172_v44, %v6575_v35 }
 0x211   : > { %v2791_v31 = vpop.f32.mrf.mxu0  ;;  %v4445_v25 = vpop.f32.mrf.mxu1  ;;  %v2267_v58 = vadd.f32 %v6574_v40, %v1958_v57 }
 0x212   : > { %2939 = vst [vmem:[%s6205_s5 + $0x90] sm:$0xff] %v2907_v59  ;;  %v2910_v23 = vadd.f32 %v6195_v37, %v2871_v6  ;;  %v2870_v13 = vadd.f32 %v2791_v31, %v2564_v50  ;;  %v2567_v39 = vadd.f32 %v4445_v25, %v2261_v9  ;;  %v6576_v59 = vld [vmem:[#allocation42_spill] sm:$0xff]  ;;  %v1959_v31 = vadd.f32 %v6578_v63, %v6577_v22 }
 0x213   : > { %v4525_v4 = vpop.f32.mrf.mxu0  ;;  %v2495_v24 = vpop.f32.mrf.mxu1  ;;  %v2266_v6 = vadd.f32 %v6576_v59, %v1957_v54 }
 0x214   : > { %2942 = vst [vmem:[%s6205_s5 + $0xa8] sm:$0xff] %v2910_v23  ;;  %v2909_v43 = vadd.f32 %v6195_v37, %v2870_v13  ;;  %v2873_v48 = vadd.f32 %v4525_v4, %v2567_v39  ;;  %v2566_v26 = vadd.f32 %v2495_v24, %v2260_v38  ;;  %v6579_v13 = vld [vmem:[#allocation43_spill] sm:$0xff]  ;;  %v2268_v61 = vadd.f32 %v6580_v1, %v1959_v31 }
 0x215   : > { %v2801_v14 = vpop.f32.mrf.mxu0  ;;  %v4448_v49 = vpop.f32.mrf.mxu1  ;;  %v2269_v39 = vadd.f32 %v6579_v13, %v1960_v51 }
 0x216   : > { %2941 = vst [vmem:[%s6205_s5 + $0xa0] sm:$0xff] %v2909_v43  ;;  %v2912_v28 = vadd.f32 %v6195_v37, %v2873_v48  ;;  %v2872_v21 = vadd.f32 %v2801_v14, %v2566_v26  ;;  %v2569_v32 = vadd.f32 %v4448_v49, %v2263_v18 }
 0x217   : > { %v4528_v52 = vpop.f32.mrf.mxu0  ;;  %v2505_v42 = vpop.f32.mrf.mxu1 }
 0x218   : > { %2944 = vst [vmem:[%s6205_s5 + $0xb8] sm:$0xff] %v2912_v28  ;;  %v2911_v46 = vadd.f32 %v6195_v37, %v2872_v21  ;;  %v2875_v7 = vadd.f32 %v4528_v52, %v2569_v32  ;;  %v2568_v41 = vadd.f32 %v2505_v42, %v2262_v30 }
 0x219   : > { %v2811_v11 = vpop.f32.mrf.mxu0  ;;  %v4451_v0 = vpop.f32.mrf.mxu1 }
 0x21a   : > { %2943 = vst [vmem:[%s6205_s5 + $0xb0] sm:$0xff] %v2911_v46  ;;  %v2914_v12 = vadd.f32 %v6195_v37, %v2875_v7  ;;  %v2874_v34 = vadd.f32 %v2811_v11, %v2568_v41  ;;  %v2571_v17 = vadd.f32 %v4451_v0, %v2265_v36 }
 0x21b   : > { %v4531_v10 = vpop.f32.mrf.mxu0  ;;  %v2515_v62 = vpop.f32.mrf.mxu1 }
 0x21c   : > { %2946 = vst [vmem:[%s6205_s5 + $0xc8] sm:$0xff] %v2914_v12  ;;  %v2913_v16 = vadd.f32 %v6195_v37, %v2874_v34  ;;  %v2877_v20 = vadd.f32 %v4531_v10, %v2571_v17  ;;  %v2570_v9 = vadd.f32 %v2515_v62, %v2264_v60 }
 0x21d   : > { %v2821_v50 = vpop.f32.mrf.mxu0  ;;  %v4454_v47 = vpop.f32.mrf.mxu1 }
 0x21e   : > { %2945 = vst [vmem:[%s6205_s5 + $0xc0] sm:$0xff] %v2913_v16  ;;  %v2916_v25 = vadd.f32 %v6195_v37, %v2877_v20  ;;  %v2876_v55 = vadd.f32 %v2821_v50, %v2570_v9  ;;  %v2573_v38 = vadd.f32 %v4454_v47, %v2267_v58 }
 0x21f   : > { %v4534_v44 = vpop.f32.mrf.mxu0  ;;  %v2525_v23 = vpop.f32.mrf.mxu1 }
 0x220   : > { %2948 = vst [vmem:[%s6205_s5 + $0xd8] sm:$0xff] %v2916_v25  ;;  %v2915_v3 = vadd.f32 %v6195_v37, %v2876_v55  ;;  %v2879_v18 = vadd.f32 %v4534_v44, %v2573_v38  ;;  %v2572_v4 = vadd.f32 %v2525_v23, %v2266_v6 }
 0x221   : > { %v2831_v24 = vpop.f32.mrf.mxu0  ;;  %v4457_v2 = vpop.f32.mrf.mxu1 }
 0x222   : > { %2947 = vst [vmem:[%s6205_s5 + $0xd0] sm:$0xff] %v2915_v3  ;;  %v2918_v43 = vadd.f32 %v6195_v37, %v2879_v18  ;;  %v2878_v48 = vadd.f32 %v2831_v24, %v2572_v4  ;;  %v2575_v26 = vadd.f32 %v4457_v2, %v2269_v39 }
 0x223   : > { %v4537_v15 = vpop.f32.mrf.mxu0  ;;  %v2535_v30 = vpop.f32.mrf.mxu1 }
 0x224   : > { %2950 = vst [vmem:[%s6205_s5 + $0xe8] sm:$0xff] %v2918_v43  ;;  %v2917_v14 = vadd.f32 %v6195_v37, %v2878_v48  ;;  %v2881_v49 = vadd.f32 %v4537_v15, %v2575_v26  ;;  %v2574_v5 = vadd.f32 %v2535_v30, %v2268_v61 }
 0x225   : > { %v2841_v56 = vpop.f32.mrf.mxu0 }
 0x226   : > { %2949 = vst [vmem:[%s6205_s5 + $0xe0] sm:$0xff] %v2917_v14  ;;  %v2920_v45 = vadd.f32 %v6195_v37, %v2881_v49  ;;  %v2880_v28 = vadd.f32 %v2841_v56, %v2574_v5 }
 0x228   : > { %2952 = vst [vmem:[%s6205_s5 + $0xf8] sm:$0xff] %v2920_v45  ;;  %v2919_v21 = vadd.f32 %v6195_v37, %v2880_v28 }
 0x22a   : > { %2951 = vst [vmem:[%s6205_s5 + $0xf0] sm:$0xff] %v2919_v21 }
 0x22b   : > { %4641 = shalt.err (!%p4638_p5)
}
 0x22c   : > { %s4642_s23 = scalar_lea.hbm %s6349_s10, 4096  ;;  %s4646_s26 = scalar_lea.hbm %s6406_s3, 8192 }
 0x22d   : > { %p4643_p6 = scmp.ne.s32.totalorder %s6349_s10, %s4642_s23  ;;  %p4647_p10 = scmp.lt.s32.totalorder %s6349_s10, %s6406_s3 }
 0x22e   : > { %p4648_p11 = scmp.lt.s32.totalorder %s4646_s26, %s4642_s23 }
 0x22f   : > { %p4644_p7 = pnand %p4643_p6, %p4769_p4 }
 0x230   : > { %p4649_p12 = por %p4648_p11, %p4647_p10 }
 0x231   : > { %p4645_p9 = pneg %p4644_p7 }
 0x233   : > { %p4650_p13 = pnand %p4649_p12, %p4645_p9 }
 0x235   : > { %4653 = shalt.err (!%p4650_p13)
}
 0x236   : > { %s4707_s4 = smov 128   ;;  %s4708_s5 = smov 8  }
 0x237   : > { %4571 = dma.vmem_to_hbm [thread:$0]  (%p4769_p4), %s6351_s7, 4096, %s6349_s10, %s6358_s15, %s4707_s4, %s4707_s4, %s4708_s5  }
 0x238 PF: > { %p4577_p0 = scmp.ge.s32.totalorder %s4704_s17, 2  ;;  %s2984_s6 = sand.u32 1, %s4684_s12  }
 0x239   : > { %s2985_s8 = scalar_lea.sflag [#allocation3], %s2984_s6 }
 0x23a   : > { %p4574_p1 = pnand %p4577_p0, %p4776_p8 }
 0x23c   : > { %p4575_p2 = pneg %p4574_p1 }
 0x23e   : > { %4679 = dma.done.wait (%p4575_p2), %s2985_s8, 4096  }
 0x23f   : > { %4681 = vsyncadd (%p4575_p2), %s2985_s8, 4294963200  ;;  %s16_s17 = sadd.s32 1, %s4704_s17   ;;  %s6581_s12 = smov %s4688_s13 }
 0x240   : > { %p13_p3 = scmp.ge.s32.totalorder %s16_s17, 4   ;;  %s6582_s13 = smov %s4692_s14 }
 0x241   : > { %s6583_s14 = smov %s4782_s25  ;;  %s6584_s15 = smov %s4700_s16 }
 0x242   : > { %s6585_s16 = smov %s6587_s20  ;;  %15 = sbr.rel (!%p13_p3) target bundleno = 4 (0x4), region = 78 }
 0x247   :  { %2990 = vsyncpa [#allocation3], 1 }
 0x248   :  { %2992 = vsyncpa [#allocation3 + $0x1], 1 }

</bundles_post_ra>
